<compile_context>
chip_gen: v5e
topology: v5e:2x2
jax: 0.10.0
libtpu: 0.0.40
codegen_flags: <defaults>
</compile_context>

<pallas_src>
import functools

import jax
import jax.numpy as jnp
from jax import lax
from jax.experimental import pallas as pl
from jax.experimental.pallas import tpu as pltpu

BN_EPS = 1e-5
LANE = 128
SUBLANE = 8
VMEM_LIMIT = 32 * 1024 * 1024  # explicit scoped-VMEM budget; fits v5e/v6e/v7x


def _round_up(x, m):
    return (x + m - 1) // m * m


def _m_tiling(m):
    """Row-tile size / padded row count for the im2col matrix (v7x-safe)."""
    tm = min(512, _round_up(m, SUBLANE))
    return tm, _round_up(m, tm)


def _pad2d(x, rows, cols):
    r, c = x.shape
    return jnp.pad(x, ((0, rows - r), (0, cols - c)))


def _compiler_params():
    return pltpu.CompilerParams(
        dimension_semantics=("parallel",),
        vmem_limit_bytes=VMEM_LIMIT,
    )


# ----------------------------------------------------------------------------
# Pass 1 kernels: tiled matmul (bf16 -> f32 acc) + per-tile BN partial stats.
# ----------------------------------------------------------------------------
def _matmul_stats_kernel(a_ref, w_ref, y_ref, stats_ref):
    y = jnp.dot(a_ref[...], w_ref[...], preferred_element_type=jnp.float32)
    y_ref[...] = y
    stats_ref[0, :, :] = jnp.concatenate(
        [jnp.sum(y, axis=0, keepdims=True),
         jnp.sum(y * y, axis=0, keepdims=True)], axis=0)


def _matmul_stats_shortcut_kernel(a_ref, w_ref, xs_ref, ws_ref,
                                  y_ref, ys_ref, stats_ref):
    # conv2 matmul + fused 1x1-shortcut matmul on the same row tile.
    y = jnp.dot(a_ref[...], w_ref[...], preferred_element_type=jnp.float32)
    ys = jnp.dot(xs_ref[...], ws_ref[...], preferred_element_type=jnp.float32)
    y_ref[...] = y
    ys_ref[...] = ys
    stats_ref[0, :, :] = jnp.concatenate(
        [jnp.sum(y, axis=0, keepdims=True),
         jnp.sum(y * y, axis=0, keepdims=True),
         jnp.sum(ys, axis=0, keepdims=True),
         jnp.sum(ys * ys, axis=0, keepdims=True)], axis=0)


# ----------------------------------------------------------------------------
# Pass 2 kernels: fused BN scale/shift (+ residual) + ReLU over row tiles.
# ----------------------------------------------------------------------------
def _bn_relu_kernel(y_ref, scale_ref, shift_ref, o_ref):
    o_ref[...] = jnp.maximum(
        y_ref[...] * scale_ref[...] + shift_ref[...], 0.0).astype(o_ref.dtype)


def _bn_add_relu_kernel(y_ref, ys_ref, scale_ref, shift_ref,
                        scale_s_ref, shift_s_ref, o_ref):
    out = (y_ref[...] * scale_ref[...] + shift_ref[...]
           + ys_ref[...].astype(jnp.float32) * scale_s_ref[...] + shift_s_ref[...])
    o_ref[...] = jnp.maximum(out, 0.0).astype(o_ref.dtype)


# ----------------------------------------------------------------------------
# Pallas-call wrappers.
# ----------------------------------------------------------------------------
def matmul_with_bn_stats(a, w_mat, *, tm, m_pad, c_pad, shortcut=None):
    """(M, K) @ (K, C) tiled over M; returns padded f32 product + per-channel
    (sum, sumsq) reduced over the true rows.  Optionally fuses the 1x1
    shortcut matmul (a_s, w_s) on the same row tiles."""
    _, k = a.shape
    k_pad = _round_up(k, LANE)
    n_tiles = m_pad // tm

    a_p = _pad2d(a, m_pad, k_pad).astype(jnp.bfloat16)
    w_p = _pad2d(w_mat, k_pad, c_pad).astype(jnp.bfloat16)

    if shortcut is None:
        flops = 2 * m_pad * k_pad * c_pad
        bytes_acc = (a_p.size + w_p.size) * 2 + (m_pad + 2 * n_tiles) * c_pad * 4
        y, partial = pl.pallas_call(
            _matmul_stats_kernel,
            out_shape=(jax.ShapeDtypeStruct((m_pad, c_pad), jnp.float32),
                       jax.ShapeDtypeStruct((n_tiles, 2, c_pad), jnp.float32)),
            grid_spec=pltpu.PrefetchScalarGridSpec(
                num_scalar_prefetch=0,
                grid=(n_tiles,),
                in_specs=[pl.BlockSpec((tm, k_pad), lambda i: (i, 0)),
                          pl.BlockSpec((k_pad, c_pad), lambda i: (0, 0))],
                out_specs=[pl.BlockSpec((tm, c_pad), lambda i: (i, 0)),
                           pl.BlockSpec((1, 2, c_pad), lambda i: (i, 0, 0))]),
            compiler_params=_compiler_params(),
            cost_estimate=pl.CostEstimate(flops=flops, transcendentals=0,
                                          bytes_accessed=bytes_acc),
        )(a_p, w_p)
        return y, jnp.sum(partial, axis=0), None, None

    a_s, w_s = shortcut
    ks_pad = _round_up(a_s.shape[1], LANE)
    a_sp = _pad2d(a_s, m_pad, ks_pad).astype(jnp.bfloat16)
    w_sp = _pad2d(w_s, ks_pad, c_pad).astype(jnp.bfloat16)

    flops = 2 * m_pad * (k_pad + ks_pad) * c_pad
    bytes_acc = ((a_p.size + w_p.size + a_sp.size + w_sp.size) * 2
                 + (2 * m_pad + 4 * n_tiles) * c_pad * 4)
    y, ys, partial = pl.pallas_call(
        _matmul_stats_shortcut_kernel,
        out_shape=(jax.ShapeDtypeStruct((m_pad, c_pad), jnp.float32),
                   jax.ShapeDtypeStruct((m_pad, c_pad), jnp.float32),
                   jax.ShapeDtypeStruct((n_tiles, 4, c_pad), jnp.float32)),
        grid_spec=pltpu.PrefetchScalarGridSpec(
            num_scalar_prefetch=0,
            grid=(n_tiles,),
            in_specs=[pl.BlockSpec((tm, k_pad), lambda i: (i, 0)),
                      pl.BlockSpec((k_pad, c_pad), lambda i: (0, 0)),
                      pl.BlockSpec((tm, ks_pad), lambda i: (i, 0)),
                      pl.BlockSpec((ks_pad, c_pad), lambda i: (0, 0))],
            out_specs=[pl.BlockSpec((tm, c_pad), lambda i: (i, 0)),
                       pl.BlockSpec((tm, c_pad), lambda i: (i, 0)),
                       pl.BlockSpec((1, 4, c_pad), lambda i: (i, 0, 0))]),
        compiler_params=_compiler_params(),
        cost_estimate=pl.CostEstimate(flops=flops, transcendentals=0,
                                      bytes_accessed=bytes_acc),
    )(a_p, w_p, a_sp, w_sp)
    partial = jnp.sum(partial, axis=0)
    return y, partial[:2], ys, partial[2:]


def bn_relu_apply(y_pad, scale, shift, *, tm, out_dtype=jnp.float32):
    m_pad, c_pad = y_pad.shape
    n_tiles = m_pad // tm
    return pl.pallas_call(
        _bn_relu_kernel,
        out_shape=jax.ShapeDtypeStruct((m_pad, c_pad), out_dtype),
        grid_spec=pltpu.PrefetchScalarGridSpec(
            num_scalar_prefetch=0,
            grid=(n_tiles,),
            in_specs=[pl.BlockSpec((tm, c_pad), lambda i: (i, 0)),
                      pl.BlockSpec((1, c_pad), lambda i: (0, 0)),
                      pl.BlockSpec((1, c_pad), lambda i: (0, 0))],
            out_specs=pl.BlockSpec((tm, c_pad), lambda i: (i, 0))),
        compiler_params=_compiler_params(),
    )(y_pad, scale, shift)


def bn_add_relu_apply(y_pad, ys_pad, scale, shift, scale_s, shift_s, *, tm,
                      out_dtype=jnp.float32):
    m_pad, c_pad = y_pad.shape
    n_tiles = m_pad // tm
    return pl.pallas_call(
        _bn_add_relu_kernel,
        out_shape=jax.ShapeDtypeStruct((m_pad, c_pad), out_dtype),
        grid_spec=pltpu.PrefetchScalarGridSpec(
            num_scalar_prefetch=0,
            grid=(n_tiles,),
            in_specs=[pl.BlockSpec((tm, c_pad), lambda i: (i, 0)),
                      pl.BlockSpec((tm, c_pad), lambda i: (i, 0)),
                      pl.BlockSpec((1, c_pad), lambda i: (0, 0)),
                      pl.BlockSpec((1, c_pad), lambda i: (0, 0)),
                      pl.BlockSpec((1, c_pad), lambda i: (0, 0)),
                      pl.BlockSpec((1, c_pad), lambda i: (0, 0))],
            out_specs=pl.BlockSpec((tm, c_pad), lambda i: (i, 0))),
        compiler_params=_compiler_params(),
    )(y_pad, ys_pad, scale, shift, scale_s, shift_s)


# ----------------------------------------------------------------------------
# Plain-JAX glue: im2col, weight reshaping, BN scale/shift from stats.
# ----------------------------------------------------------------------------
def _im2col(x_nhwc, kh, kw, stride, padding):
    n, h, w, c = x_nhwc.shape
    xp = jnp.pad(x_nhwc, ((0, 0), (padding, padding), (padding, padding), (0, 0)))
    ho = (h + 2 * padding - kh) // stride + 1
    wo = (w + 2 * padding - kw) // stride + 1
    taps = []
    for i in range(kh):
        for j in range(kw):
            taps.append(xp[:, i:i + stride * ho:stride, j:j + stride * wo:stride, :])
    patches = jnp.concatenate(taps, axis=-1)  # (N, Ho, Wo, KH*KW*C)
    return patches.reshape(n * ho * wo, kh * kw * c), ho, wo


def _w_oihw_to_mat(w_oihw):
    # (Cout, Cin, KH, KW) -> (KH*KW*Cin, Cout), matching im2col tap order.
    cout, cin, kh, kw = w_oihw.shape
    return jnp.transpose(w_oihw, (2, 3, 1, 0)).reshape(kh * kw * cin, cout)


def _bn_scale_shift(stats, gamma, beta, m_true, c_pad):
    """(sum, sumsq) -> per-channel scale/shift (biased variance, eps=1e-5)."""
    mean = stats[0] / m_true
    var = stats[1] / m_true - mean * mean          # E[y^2] - E[y]^2, single pass
    g = jnp.pad(gamma, (0, c_pad - gamma.shape[0]))
    b = jnp.pad(beta, (0, c_pad - beta.shape[0]))
    scale = g * lax.rsqrt(var + BN_EPS)
    shift = b - mean * scale
    return scale.reshape(1, c_pad), shift.reshape(1, c_pad)


def basic_block_forward(x_nchw, params, stride, has_shortcut, groups=1):
    if groups != 1:
        # TODO(synk): grouped convolution (use_grouped=True, groups>1) not implemented.
        raise NotImplementedError("grouped convolution not implemented")

    n, cin, h, w = x_nchw.shape
    planes = params["w1"].shape[0]
    x = jnp.transpose(x_nchw, (0, 2, 3, 1))          # NHWC f32 (kept for identity skip)
    x_bf = x.astype(jnp.bfloat16)                    # bf16 feed for all MXU paths

    ho = (h + 2 - 3) // stride + 1
    wo = (w + 2 - 3) // stride + 1
    m = n * ho * wo
    tm, m_pad = _m_tiling(m)
    c_pad = _round_up(planes, LANE)

    # ---- conv1 (3x3, stride, pad 1) -> bn1 -> relu --------------------------
    a1, _, _ = _im2col(x_bf, 3, 3, stride, 1)
    y1, stats1, _, _ = matmul_with_bn_stats(
        a1, _w_oihw_to_mat(params["w1"]), tm=tm, m_pad=m_pad, c_pad=c_pad)
    sc1, sh1 = _bn_scale_shift(stats1, params["g1"], params["b1"], m, c_pad)
    out1 = bn_relu_apply(y1, sc1, sh1, tm=tm, out_dtype=jnp.bfloat16)
    out1_img = out1[:m, :planes].reshape(n, ho, wo, planes)

    # ---- conv2 (3x3, stride 1, pad 1) [+ fused 1x1 shortcut] ----------------
    a2, _, _ = _im2col(out1_img, 3, 3, 1, 1)
    w2_mat = _w_oihw_to_mat(params["w2"])
    if has_shortcut:
        a_s = x_bf[:, ::stride, ::stride, :].reshape(m, cin)
        y2, stats2, ys, stats_s = matmul_with_bn_stats(
            a2, w2_mat, tm=tm, m_pad=m_pad, c_pad=c_pad,
            shortcut=(a_s, _w_oihw_to_mat(params["ws"])))
        sc2, sh2 = _bn_scale_shift(stats2, params["g2"], params["b2"], m, c_pad)
        scs, shs = _bn_scale_shift(stats_s, params["gs"], params["bs"], m, c_pad)
    else:
        y2, stats2, _, _ = matmul_with_bn_stats(
            a2, w2_mat, tm=tm, m_pad=m_pad, c_pad=c_pad)
        sc2, sh2 = _bn_scale_shift(stats2, params["g2"], params["b2"], m, c_pad)
        # Identity skip connection: raw f32 input rows, unit scale / zero shift.
        ys = _pad2d(x.reshape(m, cin), m_pad, c_pad)
        scs = jnp.ones((1, c_pad), jnp.float32)
        shs = jnp.zeros((1, c_pad), jnp.float32)

    out2 = bn_add_relu_apply(y2, ys, sc2, sh2, scs, shs, tm=tm)
    out2 = out2[:m, :planes].reshape(n, ho, wo, planes)
    return jnp.transpose(out2, (0, 3, 1, 2))          # back to NCHW


# ----------------------------------------------------------------------------
# Pure-JAX reference (lax.conv) for correctness checking.
# ----------------------------------------------------------------------------
def _ref_forward(x, params, stride, has_shortcut):
    def conv(x, w, s, p):
        return lax.conv_general_dilated(
            x, w, (s, s), [(p, p), (p, p)],
            dimension_numbers=("NCHW", "OIHW", "NCHW"))

    def bn(y, g, b):
        mean = y.mean(axis=(0, 2, 3), keepdims=True)
        var = ((y - mean) ** 2).mean(axis=(0, 2, 3), keepdims=True)
        return ((y - mean) * lax.rsqrt(var + BN_EPS)
                * g.reshape(1, -1, 1, 1) + b.reshape(1, -1, 1, 1))

    out = jax.nn.relu(bn(conv(x, params["w1"], stride, 1), params["g1"], params["b1"]))
    out = bn(conv(out, params["w2"], 1, 1), params["g2"], params["b2"])
    sc = (bn(conv(x, params["ws"], stride, 0), params["gs"], params["bs"])
          if has_shortcut else x)
    return jax.nn.relu(out + sc)


def _make_params(key, in_planes, planes, has_shortcut):
    k1, k2, ks = jax.random.split(key, 3)
    params = {
        "w1": 0.1 * jax.random.normal(k1, (planes, in_planes, 3, 3), jnp.float32),
        "g1": jnp.ones((planes,), jnp.float32),
        "b1": jnp.zeros((planes,), jnp.float32),
        "w2": 0.1 * jax.random.normal(k2, (planes, planes, 3, 3), jnp.float32),
        "g2": jnp.ones((planes,), jnp.float32),
        "b2": jnp.zeros((planes,), jnp.float32),
    }
    if has_shortcut:
        params["ws"] = 0.1 * jax.random.normal(ks, (planes, in_planes, 1, 1), jnp.float32)
        params["gs"] = jnp.ones((planes,), jnp.float32)
        params["bs"] = jnp.zeros((planes,), jnp.float32)
    return params


if __name__ == "__main__":
    key = jax.random.PRNGKey(0)
    k_x1, k_p1, k_x2, k_p2 = jax.random.split(key, 4)

    # Case 1: BasicBlock(in_planes=4, planes=8, stride=2) -> conv shortcut branch.
    in_planes, planes, stride = 4, 8, 2
    has_shortcut = (stride != 1) or (in_planes != planes)
    x = jax.random.normal(k_x1, (2, in_planes, 16, 16), jnp.float32)
    params = _make_params(k_p1, in_planes, planes, has_shortcut)
    fwd = jax.jit(functools.partial(basic_block_forward,
                                    stride=stride, has_shortcut=has_shortcut))
    out = jax.block_until_ready(fwd(x, params))
    ref = _ref_forward(x, params, stride, has_shortcut)
    assert out.shape == (2, planes, 8, 8), out.shape
    # bf16 MXU inputs -> bf16-appropriate tolerance vs the f32 reference.
    assert jnp.allclose(out, ref, atol=5e-2, rtol=5e-2), \
        float(jnp.max(jnp.abs(out - ref)))

    # Case 2: BasicBlock(in_planes=8, planes=8, stride=1) -> identity shortcut.
    in_planes2, planes2, stride2 = 8, 8, 1
    has_shortcut2 = (stride2 != 1) or (in_planes2 != planes2)
    x2 = jax.random.normal(k_x2, (2, in_planes2, 16, 16), jnp.float32)
    params2 = _make_params(k_p2, in_planes2, planes2, has_shortcut2)
    fwd2 = jax.jit(functools.partial(basic_block_forward,
                                     stride=stride2, has_shortcut=has_shortcut2))
    out2 = jax.block_until_ready(fwd2(x2, params2))
    ref2 = _ref_forward(x2, params2, stride2, has_shortcut2)
    assert out2.shape == (2, planes2, 16, 16), out2.shape
    assert jnp.allclose(out2, ref2, atol=5e-2, rtol=5e-2), \
        float(jnp.max(jnp.abs(out2 - ref2)))

    print("KERNEL_OK")
</pallas_src>

<mosaic_0001>
module attributes {stable_mosaic.version = 11 : i64} {
  func.func @_matmul_stats_kernel(%arg0: i32, %arg1: memref<128x128xbf16, #tpu.memory_space<vmem>>, %arg2: memref<128x128xbf16, #tpu.memory_space<vmem>>, %arg3: memref<128x128xf32, #tpu.memory_space<vmem>>, %arg4: memref<1x2x128xf32, #tpu.memory_space<vmem>>) attributes {dimension_semantics = [#tpu.dimension_semantics<parallel>], iteration_bounds = array<i64: 1>, scalar_prefetch = 0 : i64, scratch_operands = 0 : i64, tpu.core_type = #tpu.core_type<tc>, window_params = [{transform_indices = @transform_0, window_bounds = array<i64: 128, 128>}, {pipeline_mode = #tpu.pipeline_mode<synchronous>, transform_indices = @transform_1, window_bounds = array<i64: 128, 128>}, {transform_indices = @transform_2, window_bounds = array<i64: 128, 128>}, {transform_indices = @transform_3, window_bounds = array<i64: 1, 2, 128>}]} {
    %c0 = arith.constant 0 : index
    %c0_0 = arith.constant 0 : index
    %0 = vector.load %arg1[%c0, %c0_0] : memref<128x128xbf16, #tpu.memory_space<vmem>>, vector<128x128xbf16>
    %c0_1 = arith.constant 0 : index
    %c0_2 = arith.constant 0 : index
    %1 = vector.load %arg2[%c0_1, %c0_2] : memref<128x128xbf16, #tpu.memory_space<vmem>>, vector<128x128xbf16>
    %cst = arith.constant dense<0.000000e+00> : vector<128x128xf32>
    %2 = tpu.matmul %0, %1, %cst {dimension_numbers = #tpu.dot_dimension_numbers<[1], [0], [0], [1], [0, 0, 1, 1], [], []>} : vector<128x128xbf16>, vector<128x128xbf16>, vector<128x128xf32> -> vector<128x128xf32>
    %c0_3 = arith.constant 0 : index
    %c0_4 = arith.constant 0 : index
    %3 = vector.load %arg3[%c0_3, %c0_4] : memref<128x128xf32, #tpu.memory_space<vmem>>, vector<128x128xf32>
    tpu.vector_store %arg3[%c0_3, %c0_4], %2 {strides = array<i32>} : memref<128x128xf32, #tpu.memory_space<vmem>>, vector<128x128xf32>,
    %cst_5 = arith.constant dense<0.000000e+00> : vector<128xf32>
    %4 = vector.multi_reduction <add>, %2, %cst_5 [0] : vector<128x128xf32> to vector<128xf32>
    %5 = vector.shape_cast %4 : vector<128xf32> to vector<1x128xf32>
    %6 = arith.mulf %2, %2 : vector<128x128xf32>
    %cst_6 = arith.constant dense<0.000000e+00> : vector<128xf32>
    %7 = vector.multi_reduction <add>, %6, %cst_6 [0] : vector<128x128xf32> to vector<128xf32>
    %8 = vector.shape_cast %7 : vector<128xf32> to vector<1x128xf32>
    %9 = tpu.concatenate %5, %8 in 0 : vector<1x128xf32>, vector<1x128xf32> -> vector<2x128xf32>
    %c0_7 = arith.constant 0 : index
    %c0_8 = arith.constant 0 : index
    %c0_9 = arith.constant 0 : index
    %10 = vector.load %arg4[%c0_7, %c0_8, %c0_9] : memref<1x2x128xf32, #tpu.memory_space<vmem>>, vector<1x2x128xf32>
    %11 = vector.shape_cast %10 : vector<1x2x128xf32> to vector<2x128xf32>
    %12 = vector.shape_cast %9 : vector<2x128xf32> to vector<1x2x128xf32>
    tpu.vector_store %arg4[%c0_7, %c0_8, %c0_9], %12 {strides = array<i32>} : memref<1x2x128xf32, #tpu.memory_space<vmem>>, vector<1x2x128xf32>,
    return
  }
  func.func @transform_0(%arg0: i32) -> (i32, i32) {
    %c0_i32 = arith.constant 0 : i32
    %c0_i32_0 = arith.constant 0 : i32
    return %arg0, %c0_i32 : i32, i32
  }
  func.func @transform_1(%arg0: i32) -> (i32, i32) {
    %c0_i32 = arith.constant 0 : i32
    %c0_i32_0 = arith.constant 0 : i32
    %c0_i32_1 = arith.constant 0 : i32
    return %c0_i32, %c0_i32_0 : i32, i32
  }
  func.func @transform_2(%arg0: i32) -> (i32, i32) {
    %c0_i32 = arith.constant 0 : i32
    %c0_i32_0 = arith.constant 0 : i32
    return %arg0, %c0_i32 : i32, i32
  }
  func.func @transform_3(%arg0: i32) -> (i32, i32, i32) {
    %c0_i32 = arith.constant 0 : i32
    %c0_i32_0 = arith.constant 0 : i32
    %c0_i32_1 = arith.constant 0 : i32
    return %arg0, %c0_i32, %c0_i32_0 : i32, i32, i32
  }
}

module attributes {stable_mosaic.version = 11 : i64} {
  func.func @_bn_relu_kernel(%arg0: i32, %arg1: memref<128x128xf32, #tpu.memory_space<vmem>>, %arg2: memref<1x128xf32, #tpu.memory_space<vmem>>, %arg3: memref<1x128xf32, #tpu.memory_space<vmem>>, %arg4: memref<128x128xbf16, #tpu.memory_space<vmem>>) attributes {dimension_semantics = [#tpu.dimension_semantics<parallel>], iteration_bounds = array<i64: 1>, scalar_prefetch = 0 : i64, scratch_operands = 0 : i64, tpu.core_type = #tpu.core_type<tc>, window_params = [{transform_indices = @transform_0, window_bounds = array<i64: 128, 128>}, {pipeline_mode = #tpu.pipeline_mode<synchronous>, transform_indices = @transform_1, window_bounds = array<i64: 1, 128>}, {pipeline_mode = #tpu.pipeline_mode<synchronous>, transform_indices = @transform_2, window_bounds = array<i64: 1, 128>}, {transform_indices = @transform_3, window_bounds = array<i64: 128, 128>}]} {
    %c0 = arith.constant 0 : index
    %c0_0 = arith.constant 0 : index
    %0 = vector.load %arg1[%c0, %c0_0] : memref<128x128xf32, #tpu.memory_space<vmem>>, vector<128x128xf32>
    %c0_1 = arith.constant 0 : index
    %c0_2 = arith.constant 0 : index
    %1 = vector.load %arg2[%c0_1, %c0_2] : memref<1x128xf32, #tpu.memory_space<vmem>>, vector<1x128xf32>
    %2 = vector.broadcast %1 : vector<1x128xf32> to vector<128x128xf32>
    %3 = arith.mulf %0, %2 : vector<128x128xf32>
    %c0_3 = arith.constant 0 : index
    %c0_4 = arith.constant 0 : index
    %4 = vector.load %arg3[%c0_3, %c0_4] : memref<1x128xf32, #tpu.memory_space<vmem>>, vector<1x128xf32>
    %5 = vector.broadcast %4 : vector<1x128xf32> to vector<128x128xf32>
    %6 = arith.addf %3, %5 : vector<128x128xf32>
    %cst = arith.constant 0.000000e+00 : f32
    %7 = vector.broadcast %cst : f32 to vector<128x128xf32>
    %8 = arith.maximumf %6, %7 : vector<128x128xf32>
    %9 = arith.truncf %8 : vector<128x128xf32> to vector<128x128xbf16>
    %c0_5 = arith.constant 0 : index
    %c0_6 = arith.constant 0 : index
    %10 = vector.load %arg4[%c0_5, %c0_6] : memref<128x128xbf16, #tpu.memory_space<vmem>>, vector<128x128xbf16>
    tpu.vector_store %arg4[%c0_5, %c0_6], %9 {strides = array<i32>} : memref<128x128xbf16, #tpu.memory_space<vmem>>, vector<128x128xbf16>,
    return
  }
  func.func @transform_0(%arg0: i32) -> (i32, i32) {
    %c0_i32 = arith.constant 0 : i32
    %c0_i32_0 = arith.constant 0 : i32
    return %arg0, %c0_i32 : i32, i32
  }
  func.func @transform_1(%arg0: i32) -> (i32, i32) {
    %c0_i32 = arith.constant 0 : i32
    %c0_i32_0 = arith.constant 0 : i32
    %c0_i32_1 = arith.constant 0 : i32
    return %c0_i32, %c0_i32_0 : i32, i32
  }
  func.func @transform_2(%arg0: i32) -> (i32, i32) {
    %c0_i32 = arith.constant 0 : i32
    %c0_i32_0 = arith.constant 0 : i32
    %c0_i32_1 = arith.constant 0 : i32
    return %c0_i32, %c0_i32_0 : i32, i32
  }
  func.func @transform_3(%arg0: i32) -> (i32, i32) {
    %c0_i32 = arith.constant 0 : i32
    %c0_i32_0 = arith.constant 0 : i32
    return %arg0, %c0_i32 : i32, i32
  }
}

module attributes {stable_mosaic.version = 11 : i64} {
  func.func @_matmul_stats_shortcut_kernel(%arg0: i32, %arg1: memref<128x128xbf16, #tpu.memory_space<vmem>>, %arg2: memref<128x128xbf16, #tpu.memory_space<vmem>>, %arg3: memref<128x128xbf16, #tpu.memory_space<vmem>>, %arg4: memref<128x128xbf16, #tpu.memory_space<vmem>>, %arg5: memref<128x128xf32, #tpu.memory_space<vmem>>, %arg6: memref<128x128xf32, #tpu.memory_space<vmem>>, %arg7: memref<1x4x128xf32, #tpu.memory_space<vmem>>) attributes {dimension_semantics = [#tpu.dimension_semantics<parallel>], iteration_bounds = array<i64: 1>, scalar_prefetch = 0 : i64, scratch_operands = 0 : i64, tpu.core_type = #tpu.core_type<tc>, window_params = [{transform_indices = @transform_0, window_bounds = array<i64: 128, 128>}, {pipeline_mode = #tpu.pipeline_mode<synchronous>, transform_indices = @transform_1, window_bounds = array<i64: 128, 128>}, {transform_indices = @transform_2, window_bounds = array<i64: 128, 128>}, {pipeline_mode = #tpu.pipeline_mode<synchronous>, transform_indices = @transform_3, window_bounds = array<i64: 128, 128>}, {transform_indices = @transform_4, window_bounds = array<i64: 128, 128>}, {transform_indices = @transform_5, window_bounds = array<i64: 128, 128>}, {transform_indices = @transform_6, window_bounds = array<i64: 1, 4, 128>}]} {
    %c0 = arith.constant 0 : index
    %c0_0 = arith.constant 0 : index
    %0 = vector.load %arg1[%c0, %c0_0] : memref<128x128xbf16, #tpu.memory_space<vmem>>, vector<128x128xbf16>
    %c0_1 = arith.constant 0 : index
    %c0_2 = arith.constant 0 : index
    %1 = vector.load %arg2[%c0_1, %c0_2] : memref<128x128xbf16, #tpu.memory_space<vmem>>, vector<128x128xbf16>
    %cst = arith.constant dense<0.000000e+00> : vector<128x128xf32>
    %2 = tpu.matmul %0, %1, %cst {dimension_numbers = #tpu.dot_dimension_numbers<[1], [0], [0], [1], [0, 0, 1, 1], [], []>} : vector<128x128xbf16>, vector<128x128xbf16>, vector<128x128xf32> -> vector<128x128xf32>
    %c0_3 = arith.constant 0 : index
    %c0_4 = arith.constant 0 : index
    %3 = vector.load %arg3[%c0_3, %c0_4] : memref<128x128xbf16, #tpu.memory_space<vmem>>, vector<128x128xbf16>
    %c0_5 = arith.constant 0 : index
    %c0_6 = arith.constant 0 : index
    %4 = vector.load %arg4[%c0_5, %c0_6] : memref<128x128xbf16, #tpu.memory_space<vmem>>, vector<128x128xbf16>
    %cst_7 = arith.constant dense<0.000000e+00> : vector<128x128xf32>
    %5 = tpu.matmul %3, %4, %cst_7 {dimension_numbers = #tpu.dot_dimension_numbers<[1], [0], [0], [1], [0, 0, 1, 1], [], []>} : vector<128x128xbf16>, vector<128x128xbf16>, vector<128x128xf32> -> vector<128x128xf32>
    %c0_8 = arith.constant 0 : index
    %c0_9 = arith.constant 0 : index
    %6 = vector.load %arg5[%c0_8, %c0_9] : memref<128x128xf32, #tpu.memory_space<vmem>>, vector<128x128xf32>
    tpu.vector_store %arg5[%c0_8, %c0_9], %2 {strides = array<i32>} : memref<128x128xf32, #tpu.memory_space<vmem>>, vector<128x128xf32>,
    %c0_10 = arith.constant 0 : index
    %c0_11 = arith.constant 0 : index
    %7 = vector.load %arg6[%c0_10, %c0_11] : memref<128x128xf32, #tpu.memory_space<vmem>>, vector<128x128xf32>
    tpu.vector_store %arg6[%c0_10, %c0_11], %5 {strides = array<i32>} : memref<128x128xf32, #tpu.memory_space<vmem>>, vector<128x128xf32>,
    %cst_12 = arith.constant dense<0.000000e+00> : vector<128xf32>
    %8 = vector.multi_reduction <add>, %2, %cst_12 [0] : vector<128x128xf32> to vector<128xf32>
    %9 = vector.shape_cast %8 : vector<128xf32> to vector<1x128xf32>
    %10 = arith.mulf %2, %2 : vector<128x128xf32>
    %cst_13 = arith.constant dense<0.000000e+00> : vector<128xf32>
    %11 = vector.multi_reduction <add>, %10, %cst_13 [0] : vector<128x128xf32> to vector<128xf32>
    %12 = vector.shape_cast %11 : vector<128xf32> to vector<1x128xf32>
    %cst_14 = arith.constant dense<0.000000e+00> : vector<128xf32>
    %13 = vector.multi_reduction <add>, %5, %cst_14 [0] : vector<128x128xf32> to vector<128xf32>
    %14 = vector.shape_cast %13 : vector<128xf32> to vector<1x128xf32>
    %15 = arith.mulf %5, %5 : vector<128x128xf32>
    %cst_15 = arith.constant dense<0.000000e+00> : vector<128xf32>
    %16 = vector.multi_reduction <add>, %15, %cst_15 [0] : vector<128x128xf32> to vector<128xf32>
    %17 = vector.shape_cast %16 : vector<128xf32> to vector<1x128xf32>
    %18 = tpu.concatenate %9, %12, %14, %17 in 0 : vector<1x128xf32>, vector<1x128xf32>, vector<1x128xf32>, vector<1x128xf32> -> vector<4x128xf32>
    %c0_16 = arith.constant 0 : index
    %c0_17 = arith.constant 0 : index
    %c0_18 = arith.constant 0 : index
    %19 = vector.load %arg7[%c0_16, %c0_17, %c0_18] : memref<1x4x128xf32, #tpu.memory_space<vmem>>, vector<1x4x128xf32>
    %20 = vector.shape_cast %19 : vector<1x4x128xf32> to vector<4x128xf32>
    %21 = vector.shape_cast %18 : vector<4x128xf32> to vector<1x4x128xf32>
    tpu.vector_store %arg7[%c0_16, %c0_17, %c0_18], %21 {strides = array<i32>} : memref<1x4x128xf32, #tpu.memory_space<vmem>>, vector<1x4x128xf32>,
    return
  }
  func.func @transform_0(%arg0: i32) -> (i32, i32) {
    %c0_i32 = arith.constant 0 : i32
    %c0_i32_0 = arith.constant 0 : i32
    return %arg0, %c0_i32 : i32, i32
  }
  func.func @transform_1(%arg0: i32) -> (i32, i32) {
    %c0_i32 = arith.constant 0 : i32
    %c0_i32_0 = arith.constant 0 : i32
    %c0_i32_1 = arith.constant 0 : i32
    return %c0_i32, %c0_i32_0 : i32, i32
  }
  func.func @transform_2(%arg0: i32) -> (i32, i32) {
    %c0_i32 = arith.constant 0 : i32
    %c0_i32_0 = arith.constant 0 : i32
    return %arg0, %c0_i32 : i32, i32
  }
  func.func @transform_3(%arg0: i32) -> (i32, i32) {
    %c0_i32 = arith.constant 0 : i32
    %c0_i32_0 = arith.constant 0 : i32
    %c0_i32_1 = arith.constant 0 : i32
    return %c0_i32, %c0_i32_0 : i32, i32
  }
  func.func @transform_4(%arg0: i32) -> (i32, i32) {
    %c0_i32 = arith.constant 0 : i32
    %c0_i32_0 = arith.constant 0 : i32
    return %arg0, %c0_i32 : i32, i32
  }
  func.func @transform_5(%arg0: i32) -> (i32, i32) {
    %c0_i32 = arith.constant 0 : i32
    %c0_i32_0 = arith.constant 0 : i32
    return %arg0, %c0_i32 : i32, i32
  }
  func.func @transform_6(%arg0: i32) -> (i32, i32, i32) {
    %c0_i32 = arith.constant 0 : i32
    %c0_i32_0 = arith.constant 0 : i32
    %c0_i32_1 = arith.constant 0 : i32
    return %arg0, %c0_i32, %c0_i32_0 : i32, i32, i32
  }
}

module attributes {stable_mosaic.version = 11 : i64} {
  func.func @_bn_add_relu_kernel(%arg0: i32, %arg1: memref<128x128xf32, #tpu.memory_space<vmem>>, %arg2: memref<128x128xf32, #tpu.memory_space<vmem>>, %arg3: memref<1x128xf32, #tpu.memory_space<vmem>>, %arg4: memref<1x128xf32, #tpu.memory_space<vmem>>, %arg5: memref<1x128xf32, #tpu.memory_space<vmem>>, %arg6: memref<1x128xf32, #tpu.memory_space<vmem>>, %arg7: memref<128x128xf32, #tpu.memory_space<vmem>>) attributes {dimension_semantics = [#tpu.dimension_semantics<parallel>], iteration_bounds = array<i64: 1>, scalar_prefetch = 0 : i64, scratch_operands = 0 : i64, tpu.core_type = #tpu.core_type<tc>, window_params = [{transform_indices = @transform_0, window_bounds = array<i64: 128, 128>}, {transform_indices = @transform_1, window_bounds = array<i64: 128, 128>}, {pipeline_mode = #tpu.pipeline_mode<synchronous>, transform_indices = @transform_2, window_bounds = array<i64: 1, 128>}, {pipeline_mode = #tpu.pipeline_mode<synchronous>, transform_indices = @transform_3, window_bounds = array<i64: 1, 128>}, {pipeline_mode = #tpu.pipeline_mode<synchronous>, transform_indices = @transform_4, window_bounds = array<i64: 1, 128>}, {pipeline_mode = #tpu.pipeline_mode<synchronous>, transform_indices = @transform_5, window_bounds = array<i64: 1, 128>}, {transform_indices = @transform_6, window_bounds = array<i64: 128, 128>}]} {
    %c0 = arith.constant 0 : index
    %c0_0 = arith.constant 0 : index
    %0 = vector.load %arg1[%c0, %c0_0] : memref<128x128xf32, #tpu.memory_space<vmem>>, vector<128x128xf32>
    %c0_1 = arith.constant 0 : index
    %c0_2 = arith.constant 0 : index
    %1 = vector.load %arg3[%c0_1, %c0_2] : memref<1x128xf32, #tpu.memory_space<vmem>>, vector<1x128xf32>
    %2 = vector.broadcast %1 : vector<1x128xf32> to vector<128x128xf32>
    %3 = arith.mulf %0, %2 : vector<128x128xf32>
    %c0_3 = arith.constant 0 : index
    %c0_4 = arith.constant 0 : index
    %4 = vector.load %arg4[%c0_3, %c0_4] : memref<1x128xf32, #tpu.memory_space<vmem>>, vector<1x128xf32>
    %5 = vector.broadcast %4 : vector<1x128xf32> to vector<128x128xf32>
    %6 = arith.addf %3, %5 : vector<128x128xf32>
    %c0_5 = arith.constant 0 : index
    %c0_6 = arith.constant 0 : index
    %7 = vector.load %arg2[%c0_5, %c0_6] : memref<128x128xf32, #tpu.memory_space<vmem>>, vector<128x128xf32>
    %c0_7 = arith.constant 0 : index
    %c0_8 = arith.constant 0 : index
    %8 = vector.load %arg5[%c0_7, %c0_8] : memref<1x128xf32, #tpu.memory_space<vmem>>, vector<1x128xf32>
    %9 = vector.broadcast %8 : vector<1x128xf32> to vector<128x128xf32>
    %10 = arith.mulf %7, %9 : vector<128x128xf32>
    %11 = arith.addf %6, %10 : vector<128x128xf32>
    %c0_9 = arith.constant 0 : index
    %c0_10 = arith.constant 0 : index
    %12 = vector.load %arg6[%c0_9, %c0_10] : memref<1x128xf32, #tpu.memory_space<vmem>>, vector<1x128xf32>
    %13 = vector.broadcast %12 : vector<1x128xf32> to vector<128x128xf32>
    %14 = arith.addf %11, %13 : vector<128x128xf32>
    %cst = arith.constant 0.000000e+00 : f32
    %15 = vector.broadcast %cst : f32 to vector<128x128xf32>
    %16 = arith.maximumf %14, %15 : vector<128x128xf32>
    %c0_11 = arith.constant 0 : index
    %c0_12 = arith.constant 0 : index
    %17 = vector.load %arg7[%c0_11, %c0_12] : memref<128x128xf32, #tpu.memory_space<vmem>>, vector<128x128xf32>
    tpu.vector_store %arg7[%c0_11, %c0_12], %16 {strides = array<i32>} : memref<128x128xf32, #tpu.memory_space<vmem>>, vector<128x128xf32>,
    return
  }
  func.func @transform_0(%arg0: i32) -> (i32, i32) {
    %c0_i32 = arith.constant 0 : i32
    %c0_i32_0 = arith.constant 0 : i32
    return %arg0, %c0_i32 : i32, i32
  }
  func.func @transform_1(%arg0: i32) -> (i32, i32) {
    %c0_i32 = arith.constant 0 : i32
    %c0_i32_0 = arith.constant 0 : i32
    return %arg0, %c0_i32 : i32, i32
  }
  func.func @transform_2(%arg0: i32) -> (i32, i32) {
    %c0_i32 = arith.constant 0 : i32
    %c0_i32_0 = arith.constant 0 : i32
    %c0_i32_1 = arith.constant 0 : i32
    return %c0_i32, %c0_i32_0 : i32, i32
  }
  func.func @transform_3(%arg0: i32) -> (i32, i32) {
    %c0_i32 = arith.constant 0 : i32
    %c0_i32_0 = arith.constant 0 : i32
    %c0_i32_1 = arith.constant 0 : i32
    return %c0_i32, %c0_i32_0 : i32, i32
  }
  func.func @transform_4(%arg0: i32) -> (i32, i32) {
    %c0_i32 = arith.constant 0 : i32
    %c0_i32_0 = arith.constant 0 : i32
    %c0_i32_1 = arith.constant 0 : i32
    return %c0_i32, %c0_i32_0 : i32, i32
  }
  func.func @transform_5(%arg0: i32) -> (i32, i32) {
    %c0_i32 = arith.constant 0 : i32
    %c0_i32_0 = arith.constant 0 : i32
    %c0_i32_1 = arith.constant 0 : i32
    return %c0_i32, %c0_i32_0 : i32, i32
  }
  func.func @transform_6(%arg0: i32) -> (i32, i32) {
    %c0_i32 = arith.constant 0 : i32
    %c0_i32_0 = arith.constant 0 : i32
    return %arg0, %c0_i32 : i32, i32
  }
}

</mosaic_0001>

<bundles_post_ra>
// kernel: basic_block_forward.4
= control target key start
LH: loop header
LB: loop body
LE: loop exit
PB: predicated region body
PF: predicated region fallthrough
CT: control target
= control target key end

     0   :  { %vm264_vm0 = vcmask 1040384   ;;  %s498_s1 = inlined_call_operand.vmem [shape: bf16[128,128], index: 1, kind: input, shape index: {}]   ;;  %s499_s0 = inlined_call_operand.vmem [shape: bf16[128,128], index: 0, kind: input, shape index: {}]   ;;  %s500_s2 = inlined_call_operand.vmem [shape: f32[128,128], index: 2, kind: output, shape index: {0}]   ;;  %s501_s3 = inlined_call_operand.vmem [shape: f32[1,2,128], index: 3, kind: output, shape index: {1}]  }
   0x1   :  { %v354_v0 = vld [vmem:[%s498_s1 + $0x38] sm:$0xff]  ;;  %v353_v1 = vld [vmem:[%s498_s1 + $0x30] sm:$0xff]  ;;  %v352_v2 = vld [vmem:[%s498_s1 + $0x28] sm:$0xff] }
   0x2   :  { %141 = vmatpush.bf16.msra.mxu0 %v354_v0  ;;  %355 = vmatpush.bf16.msra.mxu1 %v354_v0  ;;  %v351_v3 = vld [vmem:[%s498_s1 + $0x20] sm:$0xff]  ;;  %v350_v4 = vld [vmem:[%s498_s1 + $0x18] sm:$0xff]  ;;  %v349_v5 = vld [vmem:[%s498_s1 + $0x10] sm:$0xff] }
   0x3   :  { %356 = vmatpush.bf16.msra.mxu2 %v354_v0  ;;  %357 = vmatpush.bf16.msra.mxu3 %v354_v0  ;;  %v348_v6 = vld [vmem:[%s498_s1 + $0x8] sm:$0xff]  ;;  %v347_v7 = vld [vmem:[%s498_s1] sm:$0xff]  ;;  %v341_v9 = vld [vmem:[%s499_s0 + $0x10] sm:$0xff] }
   0x4   :  { %v339_v8 = vld [vmem:[%s499_s0] sm:$0xff]  ;;  %v345_v11 = vld [vmem:[%s499_s0 + $0x30] sm:$0xff]  ;;  %v340_v12 = vld [vmem:[%s499_s0 + $0x8] sm:$0xff] }
   0x5   :  { %v343_v10 = vld [vmem:[%s499_s0 + $0x20] sm:$0xff]  ;;  %v342_v13 = vld [vmem:[%s499_s0 + $0x18] sm:$0xff]  ;;  %v344_v14 = vld [vmem:[%s499_s0 + $0x28] sm:$0xff] }
   0x6   :  { %142 = vmatpush.bf16.msra.mxu0 %v353_v1  ;;  %358 = vmatpush.bf16.msra.mxu1 %v353_v1  ;;  %v346_v15 = vld [vmem:[%s499_s0 + $0x38] sm:$0xff] }
   0x7   :  { %359 = vmatpush.bf16.msra.mxu2 %v353_v1  ;;  %360 = vmatpush.bf16.msra.mxu3 %v353_v1 }
   0xa   :  { %143 = vmatpush.bf16.msra.mxu0 %v352_v2  ;;  %361 = vmatpush.bf16.msra.mxu1 %v352_v2 }
   0xb   :  { %362 = vmatpush.bf16.msra.mxu2 %v352_v2  ;;  %363 = vmatpush.bf16.msra.mxu3 %v352_v2 }
   0xe   :  { %144 = vmatpush.bf16.msra.mxu0 %v351_v3  ;;  %364 = vmatpush.bf16.msra.mxu1 %v351_v3 }
   0xf   :  { %365 = vmatpush.bf16.msra.mxu2 %v351_v3  ;;  %366 = vmatpush.bf16.msra.mxu3 %v351_v3 }
  0x12   :  { %145 = vmatpush.bf16.msra.mxu0 %v350_v4  ;;  %367 = vmatpush.bf16.msra.mxu1 %v350_v4 }
  0x13   :  { %368 = vmatpush.bf16.msra.mxu2 %v350_v4  ;;  %369 = vmatpush.bf16.msra.mxu3 %v350_v4 }
  0x16   :  { %146 = vmatpush.bf16.msra.mxu0 %v349_v5  ;;  %370 = vmatpush.bf16.msra.mxu1 %v349_v5 }
  0x17   :  { %371 = vmatpush.bf16.msra.mxu2 %v349_v5  ;;  %372 = vmatpush.bf16.msra.mxu3 %v349_v5 }
  0x1a   :  { %147 = vmatpush.bf16.msra.mxu0 %v348_v6  ;;  %373 = vmatpush.bf16.msra.mxu1 %v348_v6 }
  0x1b   :  { %374 = vmatpush.bf16.msra.mxu2 %v348_v6  ;;  %375 = vmatpush.bf16.msra.mxu3 %v348_v6 }
  0x1e   :  { %148 = vmatpush.bf16.msra.mxu0 %v347_v7  ;;  %376 = vmatpush.bf16.msra.mxu1 %v347_v7 }
  0x1f   :  { %377 = vmatpush.bf16.msra.mxu2 %v347_v7  ;;  %378 = vmatpush.bf16.msra.mxu3 %v347_v7 }
  0x21   :  { %149 = vmatmul.bf16.vlgmr.msra.gmra.mxu0 %v339_v8  ;;  %159 = vmatmul.bf16.vlgmr.msra.gmra.mxu1 %v341_v9 }
  0x22   :  { %169 = vmatmul.bf16.vlgmr.msra.gmra.mxu2 %v343_v10  ;;  %179 = vmatmul.bf16.vlgmr.msra.gmra.mxu3 %v345_v11 }
  0x31   :  { %154 = vmatmul.bf16.gmra.mxu0 %v340_v12  ;;  %164 = vmatmul.bf16.gmra.mxu1 %v342_v13 }
  0x32   :  { %174 = vmatmul.bf16.gmra.mxu2 %v344_v14  ;;  %184 = vmatmul.bf16.gmra.mxu3 %v346_v15 }
  0x9e   :  { %v150_v16 = vpop.f32.mrf.mxu0  ;;  %v160_v17 = vpop.f32.mrf.mxu1 }
  0x9f   :  { %190 = vst [vmem:[%s500_s2] sm:$0xff] %v150_v16  ;;  %v227_v27 = vmul.f32 %v150_v16, %v150_v16  ;;  %v231_v39 = vmul.f32 %v160_v17, %v160_v17 }
  0xa0   :  { %194 = vst [vmem:[%s500_s2 + $0x20] sm:$0xff] %v160_v17 }
  0xa5   :  { %v170_v18 = vpop.f32.mrf.mxu2  ;;  %v180_v19 = vpop.f32.mrf.mxu3 }
  0xa6   :  { %v152_v20 = vpop.f32.mrf.mxu0  ;;  %v162_v21 = vpop.f32.mrf.mxu1  ;;  %198 = vst [vmem:[%s500_s2 + $0x40] sm:$0xff] %v170_v18  ;;  %v235_v53 = vmul.f32 %v170_v18, %v170_v18  ;;  %v239_v1 = vmul.f32 %v180_v19, %v180_v19 }
  0xa7   :  { %191 = vst [vmem:[%s500_s2 + $0x8] sm:$0xff] %v152_v20  ;;  %v228_v26 = vmul.f32 %v152_v20, %v152_v20  ;;  %v206_v28 = vadd.f32 %v152_v20, %v150_v16  ;;  %v232_v42 = vmul.f32 %v162_v21, %v162_v21 }
  0xa8   :  { %195 = vst [vmem:[%s500_s2 + $0x28] sm:$0xff] %v162_v21 }
  0xa9   :  { %202 = vst [vmem:[%s500_s2 + $0x60] sm:$0xff] %v180_v19  ;;  %v243_v30 = vadd.f32 %v228_v26, %v227_v27 }
  0xad   :  { %v172_v22 = vpop.f32.mrf.mxu2  ;;  %v182_v23 = vpop.f32.mrf.mxu3 }
  0xae   :  { %v155_v24 = vpop.f32.mrf.mxu0  ;;  %v165_v25 = vpop.f32.mrf.mxu1  ;;  %199 = vst [vmem:[%s500_s2 + $0x48] sm:$0xff] %v172_v22  ;;  %v236_v56 = vmul.f32 %v172_v22, %v172_v22  ;;  %v240_v4 = vmul.f32 %v182_v23, %v182_v23 }
  0xaf   :  { %192 = vst [vmem:[%s500_s2 + $0x10] sm:$0xff] %v155_v24  ;;  %v229_v29 = vmul.f32 %v155_v24, %v155_v24  ;;  %v207_v31 = vadd.f32 %v206_v28, %v155_v24  ;;  %v233_v45 = vmul.f32 %v165_v25, %v165_v25 }
  0xb0   :  { %196 = vst [vmem:[%s500_s2 + $0x30] sm:$0xff] %v165_v25 }
  0xb1   :  { %203 = vst [vmem:[%s500_s2 + $0x68] sm:$0xff] %v182_v23  ;;  %v244_v36 = vadd.f32 %v243_v30, %v229_v29 }
  0xb5   :  { %v175_v32 = vpop.f32.mrf.mxu2  ;;  %v185_v33 = vpop.f32.mrf.mxu3 }
  0xb6   :  { %v157_v34 = vpop.f32.mrf.mxu0  ;;  %v167_v35 = vpop.f32.mrf.mxu1  ;;  %200 = vst [vmem:[%s500_s2 + $0x50] sm:$0xff] %v175_v32  ;;  %v237_v60 = vmul.f32 %v175_v32, %v175_v32  ;;  %v241_v8 = vmul.f32 %v185_v33, %v185_v33 }
  0xb7   :  { %193 = vst [vmem:[%s500_s2 + $0x18] sm:$0xff] %v157_v34  ;;  %v208_v37 = vadd.f32 %v207_v31, %v157_v34  ;;  %v230_v38 = vmul.f32 %v157_v34, %v157_v34  ;;  %v234_v51 = vmul.f32 %v167_v35, %v167_v35 }
  0xb8   :  { %197 = vst [vmem:[%s500_s2 + $0x38] sm:$0xff] %v167_v35 }
  0xb9   :  { %v209_v40 = vadd.f32 %v208_v37, %v160_v17  ;;  %v245_v41 = vadd.f32 %v244_v36, %v230_v38  ;;  %204 = vst [vmem:[%s500_s2 + $0x70] sm:$0xff] %v185_v33 }
  0xbb   :  { %v246_v43 = vadd.f32 %v245_v41, %v231_v39  ;;  %v210_v44 = vadd.f32 %v209_v40, %v162_v21 }
  0xbd   :  { %v211_v46 = vadd.f32 %v210_v44, %v165_v25  ;;  %v247_v47 = vadd.f32 %v246_v43, %v232_v42  ;;  %v177_v48 = vpop.f32.mrf.mxu2  ;;  %v187_v49 = vpop.f32.mrf.mxu3 }
  0xbe   :  { %201 = vst [vmem:[%s500_s2 + $0x58] sm:$0xff] %v177_v48  ;;  %v238_v0 = vmul.f32 %v177_v48, %v177_v48  ;;  %v242_v12 = vmul.f32 %v187_v49, %v187_v49 }
  0xbf   :  { %v212_v50 = vadd.f32 %v211_v46, %v167_v35  ;;  %v248_v52 = vadd.f32 %v247_v47, %v233_v45  ;;  %205 = vst [vmem:[%s500_s2 + $0x78] sm:$0xff] %v187_v49 }
  0xc1   :  { %v213_v54 = vadd.f32 %v212_v50, %v170_v18  ;;  %v249_v55 = vadd.f32 %v248_v52, %v234_v51 }
  0xc3   :  { %v250_v57 = vadd.f32 %v249_v55, %v235_v53  ;;  %v214_v58 = vadd.f32 %v213_v54, %v172_v22 }
  0xc5   :  { %v215_v59 = vadd.f32 %v214_v58, %v175_v32  ;;  %v251_v61 = vadd.f32 %v250_v57, %v236_v56 }
  0xc7   :  { %v252_v62 = vadd.f32 %v251_v61, %v237_v60  ;;  %v216_v63 = vadd.f32 %v215_v59, %v177_v48 }
  0xc9   :  { %v217_v2 = vadd.f32 %v216_v63, %v180_v19  ;;  %v253_v3 = vadd.f32 %v252_v62, %v238_v0 }
  0xcb   :  { %v254_v5 = vadd.f32 %v253_v3, %v239_v1  ;;  %v218_v6 = vadd.f32 %v217_v2, %v182_v23 }
  0xcd   :  { %v219_v7 = vadd.f32 %v218_v6, %v185_v33  ;;  %v255_v9 = vadd.f32 %v254_v5, %v240_v4 }
  0xcf   :  { %v256_v10 = vadd.f32 %v255_v9, %v241_v8  ;;  %v220_v11 = vadd.f32 %v219_v7, %v187_v49 }
  0xd1   :  { %v221_v13 = vrot.slane %v220_v11, 4  ;;  %v257_v14 = vadd.f32 %v256_v10, %v242_v12 }
  0xd3   :  { %v222_v15 = vadd.f32 %v221_v13, %v220_v11  ;;  %v258_v16 = vrot.slane %v257_v14, 4 }
  0xd5   :  { %v223_v17 = vrot.slane %v222_v15, 2  ;;  %v259_v18 = vadd.f32 %v258_v16, %v257_v14 }
  0xd7   :  { %v224_v20 = vadd.f32 %v223_v17, %v222_v15  ;;  %v260_v21 = vrot.slane %v259_v18, 2 }
  0xd9   :  { %v225_v22 = vrot.slane %v224_v20, 1  ;;  %v261_v19 = vadd.f32 %v260_v21, %v259_v18 }
  0xdb   :  { %v262_v24 = vrot.slane %v261_v19, 1  ;;  %v226_v25 = vadd.f32 %v225_v22, %v224_v20 }
  0xdd   :  { %v263_v23 = vadd.f32 %v262_v24, %v261_v19 }
  0xdf   :  { %v265_v26 = vsel %vm264_vm0, %v226_v25, %v263_v23 }
  0xe0   :  { %266 = vst [vmem:[%s501_s3] sm:$0x3] %v265_v26 }

// kernel: basic_block_forward.5
= control target key start
LH: loop header
LB: loop body
LE: loop exit
PB: predicated region body
PF: predicated region fallthrough
CT: control target
= control target key end

     0   :  { %s287_s0 = inlined_call_operand.vmem [shape: f32[128,128], index: 0, kind: input, shape index: {}]   ;;  %s288_s1 = inlined_call_operand.vmem [shape: f32[1,128], index: 1, kind: input, shape index: {}]   ;;  %s289_s2 = inlined_call_operand.vmem [shape: f32[1,128], index: 2, kind: input, shape index: {}]   ;;  %s290_s3 = inlined_call_operand.vmem [shape: bf16[128,128], index: 3, kind: output, shape index: {}]  }
   0x1   :  { %v14_v0 = vld [vmem:[%s287_s0] sm:$0xff]  ;;  %v15_v1 = vld [vmem:[%s287_s0 + $0x8] sm:$0xff]  ;;  %v16_v4 = vld [vmem:[%s287_s0 + $0x10] sm:$0xff] }
   0x2   :  { %v169_v2 = vld [vmem:[%s288_s1] ss:$0 sm:$0xff]  ;;  %v17_v5 = vld [vmem:[%s287_s0 + $0x18] sm:$0xff]  ;;  %v19_v11 = vld [vmem:[%s287_s0 + $0x28] sm:$0xff] }
   0x3   :  { %v203_v3 = vld [vmem:[%s289_s2] ss:$0 sm:$0xff]  ;;  %v34_v7 = vmul.f32 %v169_v2, %v14_v0  ;;  %v35_v8 = vmul.f32 %v169_v2, %v15_v1  ;;  %v36_v9 = vmul.f32 %v169_v2, %v16_v4  ;;  %v37_v10 = vmul.f32 %v169_v2, %v17_v5  ;;  %v20_v12 = vld [vmem:[%s287_s0 + $0x30] sm:$0xff]  ;;  %v21_v13 = vld [vmem:[%s287_s0 + $0x38] sm:$0xff] }
   0x4   :  { %v18_v6 = vld [vmem:[%s287_s0 + $0x20] sm:$0xff]  ;;  %v39_v15 = vmul.f32 %v169_v2, %v19_v11  ;;  %v40_v16 = vmul.f32 %v169_v2, %v20_v12  ;;  %v41_v17 = vmul.f32 %v169_v2, %v21_v13  ;;  %v23_v27 = vld [vmem:[%s287_s0 + $0x48] sm:$0xff]  ;;  %v24_v32 = vld [vmem:[%s287_s0 + $0x50] sm:$0xff] }
   0x5   :  { %v38_v14 = vmul.f32 %v169_v2, %v18_v6  ;;  %v54_v18 = vadd.f32 %v203_v3, %v34_v7  ;;  %v55_v19 = vadd.f32 %v203_v3, %v35_v8  ;;  %v56_v20 = vadd.f32 %v203_v3, %v36_v9  ;;  %v22_v26 = vld [vmem:[%s287_s0 + $0x40] sm:$0xff]  ;;  %v25_v33 = vld [vmem:[%s287_s0 + $0x58] sm:$0xff]  ;;  %v27_v39 = vld [vmem:[%s287_s0 + $0x68] sm:$0xff] }
   0x6   :  { %v57_v21 = vadd.f32 %v203_v3, %v37_v10  ;;  %v59_v23 = vadd.f32 %v203_v3, %v39_v15  ;;  %v60_v24 = vadd.f32 %v203_v3, %v40_v16  ;;  %v61_v25 = vadd.f32 %v203_v3, %v41_v17  ;;  %v26_v38 = vld [vmem:[%s287_s0 + $0x60] sm:$0xff]  ;;  %v28_v44 = vld [vmem:[%s287_s0 + $0x70] sm:$0xff]  ;;  %v29_v45 = vld [vmem:[%s287_s0 + $0x78] sm:$0xff] }
   0x7   :  { %v58_v22 = vadd.f32 %v203_v3, %v38_v14  ;;  %v70_v28 = vmax.f32 %v54_v18, 0.0  ;;  %v71_v29 = vmax.f32 %v55_v19, 0.0  ;;  %v72_v30 = vmax.f32 %v56_v20, 0.0 }
   0x8   :  { %v73_v31 = vmax.f32 %v57_v21, 0.0  ;;  %v75_v35 = vmax.f32 %v59_v23, 0.0  ;;  %v76_v36 = vmax.f32 %v60_v24, 0.0  ;;  %v77_v37 = vmax.f32 %v61_v25, 0.0 }
   0x9   :  { %v74_v34 = vmax.f32 %v58_v22, 0.0  ;;  %v125_v40 = vpack.c.bf16 %v71_v29, %v70_v28  ;;  %v42_v42 = vmul.f32 %v169_v2, %v22_v26  ;;  %v43_v43 = vmul.f32 %v169_v2, %v23_v27 }
   0xa   :  { %v130_v41 = vpack.c.bf16 %v73_v31, %v72_v30  ;;  %v140_v47 = vpack.c.bf16 %v77_v37, %v76_v36  ;;  %v44_v48 = vmul.f32 %v169_v2, %v24_v32  ;;  %v45_v49 = vmul.f32 %v169_v2, %v25_v33 }
   0xb   :  { %v135_v46 = vpack.c.bf16 %v75_v35, %v74_v34  ;;  %126 = vst [vmem:[%s290_s3] sm:$0xff] %v125_v40   ;;  %v62_v50 = vadd.f32 %v203_v3, %v42_v42  ;;  %v63_v51 = vadd.f32 %v203_v3, %v43_v43  ;;  %v46_v52 = vmul.f32 %v169_v2, %v26_v38 }
   0xc   :  { %v47_v53 = vmul.f32 %v169_v2, %v27_v39  ;;  %162 = vst [vmem:[%s290_s3 + $0x8] sm:$0xff] %v130_v41   ;;  %v64_v54 = vadd.f32 %v203_v3, %v44_v48  ;;  %v65_v55 = vadd.f32 %v203_v3, %v45_v49  ;;  %v48_v56 = vmul.f32 %v169_v2, %v28_v44 }
   0xd   :  { %v49_v57 = vmul.f32 %v169_v2, %v29_v45  ;;  %163 = vst [vmem:[%s290_s3 + $0x10] sm:$0xff] %v135_v46   ;;  %v78_v58 = vmax.f32 %v62_v50, 0.0  ;;  %v79_v59 = vmax.f32 %v63_v51, 0.0  ;;  %v66_v60 = vadd.f32 %v203_v3, %v46_v52 }
   0xe   :  { %v67_v61 = vadd.f32 %v203_v3, %v47_v53  ;;  %164 = vst [vmem:[%s290_s3 + $0x18] sm:$0xff] %v140_v47   ;;  %v80_v62 = vmax.f32 %v64_v54, 0.0  ;;  %v81_v63 = vmax.f32 %v65_v55, 0.0  ;;  %v68_v0 = vadd.f32 %v203_v3, %v48_v56 }
   0xf   :  { %v69_v1 = vadd.f32 %v203_v3, %v49_v57  ;;  %v145_v2 = vpack.c.bf16 %v79_v59, %v78_v58  ;;  %v82_v4 = vmax.f32 %v66_v60, 0.0 }
  0x10   :  { %v83_v5 = vmax.f32 %v67_v61, 0.0  ;;  %v150_v6 = vpack.c.bf16 %v81_v63, %v80_v62  ;;  %v84_v7 = vmax.f32 %v68_v0, 0.0 }
  0x11   :  { %v85_v8 = vmax.f32 %v69_v1, 0.0  ;;  %165 = vst [vmem:[%s290_s3 + $0x20] sm:$0xff] %v145_v2  }
  0x12   :  { %v155_v9 = vpack.c.bf16 %v83_v5, %v82_v4  ;;  %166 = vst [vmem:[%s290_s3 + $0x28] sm:$0xff] %v150_v6  }
  0x13   :  { %v160_v10 = vpack.c.bf16 %v85_v8, %v84_v7 }
  0x14   :  { %167 = vst [vmem:[%s290_s3 + $0x30] sm:$0xff] %v155_v9  }
  0x15   :  { %168 = vst [vmem:[%s290_s3 + $0x38] sm:$0xff] %v160_v10  }

// kernel: basic_block_forward.7
= control target key start
LH: loop header
LB: loop body
LE: loop exit
PB: predicated region body
PF: predicated region fallthrough
CT: control target
= control target key end

     0   :  { %s454_s0 = inlined_call_operand.vmem [shape: f32[128,128], index: 0, kind: input, shape index: {}]   ;;  %s455_s1 = inlined_call_operand.vmem [shape: f32[128,128], index: 1, kind: input, shape index: {}]   ;;  %s456_s2 = inlined_call_operand.vmem [shape: f32[1,128], index: 2, kind: input, shape index: {}]   ;;  %s457_s3 = inlined_call_operand.vmem [shape: f32[1,128], index: 3, kind: input, shape index: {}]   ;;  %s458_s4 = inlined_call_operand.vmem [shape: f32[1,128], index: 4, kind: input, shape index: {}]   ;;  %s459_s5 = inlined_call_operand.vmem [shape: f32[1,128], index: 5, kind: input, shape index: {}]   ;;  %s460_s6 = inlined_call_operand.vmem [shape: f32[128,128], index: 6, kind: output, shape index: {}]  }
   0x1   :  { %v23_v0 = vld [vmem:[%s454_s0] sm:$0xff]  ;;  %v24_v7 = vld [vmem:[%s454_s0 + $0x8] sm:$0xff]  ;;  %v25_v13 = vld [vmem:[%s454_s0 + $0x10] sm:$0xff] }
   0x2   :  { %v232_v1 = vld [vmem:[%s456_s2] ss:$0 sm:$0xff]  ;;  %v80_v8 = vld [vmem:[%s455_s1 + $0x8] sm:$0xff]  ;;  %v81_v14 = vld [vmem:[%s455_s1 + $0x10] sm:$0xff] }
   0x3   :  { %v237_v2 = vld [vmem:[%s457_s3] ss:$0 sm:$0xff]  ;;  %v43_v4 = vmul.f32 %v232_v1, %v23_v0  ;;  %v44_v11 = vmul.f32 %v232_v1, %v24_v7  ;;  %v26_v15 = vld [vmem:[%s454_s0 + $0x18] sm:$0xff]  ;;  %v45_v16 = vmul.f32 %v232_v1, %v25_v13  ;;  %v28_v26 = vld [vmem:[%s454_s0 + $0x28] sm:$0xff] }
   0x4   :  { %v79_v3 = vld [vmem:[%s455_s1] sm:$0xff]  ;;  %v46_v18 = vmul.f32 %v232_v1, %v26_v15  ;;  %v82_v19 = vld [vmem:[%s455_s1 + $0x18] sm:$0xff]  ;;  %v84_v27 = vld [vmem:[%s455_s1 + $0x28] sm:$0xff]  ;;  %v48_v32 = vmul.f32 %v232_v1, %v28_v26 }
   0x5   :  { %v246_v5 = vld [vmem:[%s458_s4] ss:$0 sm:$0xff]  ;;  %v63_v9 = vadd.f32 %v237_v2, %v43_v4  ;;  %v64_v23 = vadd.f32 %v237_v2, %v44_v11  ;;  %v29_v28 = vld [vmem:[%s454_s0 + $0x30] sm:$0xff]  ;;  %v65_v29 = vadd.f32 %v237_v2, %v45_v16  ;;  %v30_v42 = vld [vmem:[%s454_s0 + $0x38] sm:$0xff] }
   0x6   :  { %v251_v6 = vld [vmem:[%s459_s5] ss:$0 sm:$0xff]  ;;  %v99_v10 = vmul.f32 %v246_v5, %v79_v3  ;;  %v100_v12 = vmul.f32 %v246_v5, %v80_v8  ;;  %v101_v17 = vmul.f32 %v246_v5, %v81_v14  ;;  %v102_v24 = vmul.f32 %v246_v5, %v82_v19  ;;  %v85_v33 = vld [vmem:[%s455_s1 + $0x30] sm:$0xff]  ;;  %v86_v43 = vld [vmem:[%s455_s1 + $0x38] sm:$0xff] }
   0x7   :  { %v27_v20 = vld [vmem:[%s454_s0 + $0x20] sm:$0xff]  ;;  %v66_v30 = vadd.f32 %v237_v2, %v46_v18  ;;  %v104_v37 = vmul.f32 %v246_v5, %v84_v27  ;;  %v68_v40 = vadd.f32 %v237_v2, %v48_v32  ;;  %v49_v41 = vmul.f32 %v232_v1, %v29_v28  ;;  %v32_v58 = vld [vmem:[%s454_s0 + $0x48] sm:$0xff]  ;;  %v33_v0 = vld [vmem:[%s454_s0 + $0x50] sm:$0xff] }
   0x8   :  { %v83_v21 = vld [vmem:[%s455_s1 + $0x20] sm:$0xff]  ;;  %v115_v22 = vadd.f32 %v99_v10, %v63_v9  ;;  %v47_v25 = vmul.f32 %v232_v1, %v27_v20  ;;  %v116_v35 = vadd.f32 %v100_v12, %v64_v23  ;;  %v117_v38 = vadd.f32 %v101_v17, %v65_v29  ;;  %v88_v59 = vld [vmem:[%s455_s1 + $0x48] sm:$0xff]  ;;  %v89_v3 = vld [vmem:[%s455_s1 + $0x50] sm:$0xff] }
   0x9   :  { %v103_v31 = vmul.f32 %v246_v5, %v83_v21  ;;  %v118_v39 = vadd.f32 %v102_v24, %v66_v30  ;;  %v105_v47 = vmul.f32 %v246_v5, %v85_v33  ;;  %v120_v50 = vadd.f32 %v104_v37, %v68_v40  ;;  %v31_v52 = vld [vmem:[%s454_s0 + $0x40] sm:$0xff]  ;;  %v34_v10 = vld [vmem:[%s454_s0 + $0x58] sm:$0xff] }
   0xa   :  { %v135_v34 = vadd.f32 %v251_v6, %v115_v22  ;;  %v67_v36 = vadd.f32 %v237_v2, %v47_v25  ;;  %v136_v45 = vadd.f32 %v251_v6, %v116_v35  ;;  %v137_v48 = vadd.f32 %v251_v6, %v117_v38  ;;  %v87_v53 = vld [vmem:[%s455_s1 + $0x40] sm:$0xff]  ;;  %v90_v11 = vld [vmem:[%s455_s1 + $0x58] sm:$0xff]  ;;  %v36_v22 = vld [vmem:[%s454_s0 + $0x68] sm:$0xff] }
   0xb   :  { %v138_v49 = vadd.f32 %v251_v6, %v118_v39  ;;  %v69_v51 = vadd.f32 %v237_v2, %v49_v41  ;;  %v50_v56 = vmul.f32 %v232_v1, %v30_v42  ;;  %v106_v57 = vmul.f32 %v246_v5, %v86_v43  ;;  %v35_v16 = vld [vmem:[%s454_s0 + $0x60] sm:$0xff]  ;;  %v93_v41 = vld [vmem:[%s455_s1 + $0x70] sm:$0xff] }
   0xc   :  { %v151_v44 = vmax.f32 %v135_v34, 0.0  ;;  %v119_v46 = vadd.f32 %v103_v31, %v67_v36  ;;  %v152_v54 = vmax.f32 %v136_v45, 0.0  ;;  %v153_v60 = vmax.f32 %v137_v48, 0.0  ;;  %v91_v21 = vld [vmem:[%s455_s1 + $0x60] sm:$0xff]  ;;  %v92_v31 = vld [vmem:[%s455_s1 + $0x68] sm:$0xff]  ;;  %v37_v36 = vld [vmem:[%s454_s0 + $0x70] sm:$0xff] }
   0xd   :  { %v154_v61 = vmax.f32 %v138_v49, 0.0  ;;  %v140_v62 = vadd.f32 %v251_v6, %v120_v50  ;;  %v121_v63 = vadd.f32 %v105_v47, %v69_v51  ;;  %v70_v7 = vadd.f32 %v237_v2, %v50_v56  ;;  %v94_v51 = vld [vmem:[%s455_s1 + $0x78] sm:$0xff] }
   0xe   :  { %167 = vst [vmem:[%s460_s6] sm:$0xff] %v151_v44  ;;  %v139_v55 = vadd.f32 %v251_v6, %v119_v46  ;;  %v51_v8 = vmul.f32 %v232_v1, %v31_v52  ;;  %v107_v9 = vmul.f32 %v246_v5, %v87_v53  ;;  %v52_v14 = vmul.f32 %v232_v1, %v32_v58  ;;  %v38_v46 = vld [vmem:[%s454_s0 + $0x78] sm:$0xff] }
   0xf   :  { %168 = vst [vmem:[%s460_s6 + $0x8] sm:$0xff] %v152_v54  ;;  %v156_v12 = vmax.f32 %v140_v62, 0.0  ;;  %v141_v13 = vadd.f32 %v251_v6, %v121_v63  ;;  %v108_v15 = vmul.f32 %v246_v5, %v88_v59  ;;  %v122_v17 = vadd.f32 %v106_v57, %v70_v7 }
  0x10   :  { %v155_v4 = vmax.f32 %v139_v55, 0.0  ;;  %169 = vst [vmem:[%s460_s6 + $0x10] sm:$0xff] %v153_v60  ;;  %v71_v18 = vadd.f32 %v237_v2, %v51_v8  ;;  %v53_v19 = vmul.f32 %v232_v1, %v33_v0  ;;  %v109_v20 = vmul.f32 %v246_v5, %v89_v3 }
  0x11   :  { %170 = vst [vmem:[%s460_s6 + $0x18] sm:$0xff] %v154_v61  ;;  %v157_v23 = vmax.f32 %v141_v13, 0.0  ;;  %v72_v24 = vadd.f32 %v237_v2, %v52_v14  ;;  %v54_v25 = vmul.f32 %v232_v1, %v34_v10  ;;  %v110_v26 = vmul.f32 %v246_v5, %v90_v11 }
  0x12   :  { %171 = vst [vmem:[%s460_s6 + $0x20] sm:$0xff] %v155_v4  ;;  %v142_v27 = vadd.f32 %v251_v6, %v122_v17  ;;  %v123_v28 = vadd.f32 %v107_v9, %v71_v18  ;;  %v73_v29 = vadd.f32 %v237_v2, %v53_v19  ;;  %v55_v30 = vmul.f32 %v232_v1, %v35_v16 }
  0x13   :  { %172 = vst [vmem:[%s460_s6 + $0x28] sm:$0xff] %v156_v12  ;;  %v124_v32 = vadd.f32 %v108_v15, %v72_v24  ;;  %v74_v33 = vadd.f32 %v237_v2, %v54_v25  ;;  %v111_v34 = vmul.f32 %v246_v5, %v91_v21  ;;  %v56_v35 = vmul.f32 %v232_v1, %v36_v22 }
  0x14   :  { %173 = vst [vmem:[%s460_s6 + $0x30] sm:$0xff] %v157_v23  ;;  %v158_v37 = vmax.f32 %v142_v27, 0.0  ;;  %v143_v38 = vadd.f32 %v251_v6, %v123_v28  ;;  %v125_v39 = vadd.f32 %v109_v20, %v73_v29  ;;  %v75_v40 = vadd.f32 %v237_v2, %v55_v30 }
  0x15   :  { %v144_v42 = vadd.f32 %v251_v6, %v124_v32  ;;  %v126_v43 = vadd.f32 %v110_v26, %v74_v33  ;;  %v76_v44 = vadd.f32 %v237_v2, %v56_v35  ;;  %v112_v45 = vmul.f32 %v246_v5, %v92_v31 }
  0x16   :  { %174 = vst [vmem:[%s460_s6 + $0x38] sm:$0xff] %v158_v37  ;;  %v159_v47 = vmax.f32 %v143_v38, 0.0  ;;  %v145_v48 = vadd.f32 %v251_v6, %v125_v39  ;;  %v127_v49 = vadd.f32 %v111_v34, %v75_v40  ;;  %v57_v50 = vmul.f32 %v232_v1, %v37_v36 }
  0x17   :  { %v160_v52 = vmax.f32 %v144_v42, 0.0  ;;  %v146_v53 = vadd.f32 %v251_v6, %v126_v43  ;;  %v128_v54 = vadd.f32 %v112_v45, %v76_v44  ;;  %v113_v55 = vmul.f32 %v246_v5, %v93_v41 }
  0x18   :  { %175 = vst [vmem:[%s460_s6 + $0x40] sm:$0xff] %v159_v47  ;;  %v161_v56 = vmax.f32 %v145_v48, 0.0  ;;  %v147_v57 = vadd.f32 %v251_v6, %v127_v49  ;;  %v77_v58 = vadd.f32 %v237_v2, %v57_v50  ;;  %v58_v59 = vmul.f32 %v232_v1, %v38_v46 }
  0x19   :  { %176 = vst [vmem:[%s460_s6 + $0x48] sm:$0xff] %v160_v52  ;;  %v162_v60 = vmax.f32 %v146_v53, 0.0  ;;  %v148_v61 = vadd.f32 %v251_v6, %v128_v54  ;;  %v114_v62 = vmul.f32 %v246_v5, %v94_v51 }
  0x1a   :  { %177 = vst [vmem:[%s460_s6 + $0x50] sm:$0xff] %v161_v56  ;;  %v163_v63 = vmax.f32 %v147_v57, 0.0  ;;  %v129_v0 = vadd.f32 %v113_v55, %v77_v58  ;;  %v78_v3 = vadd.f32 %v237_v2, %v58_v59 }
  0x1b   :  { %178 = vst [vmem:[%s460_s6 + $0x58] sm:$0xff] %v162_v60  ;;  %v164_v1 = vmax.f32 %v148_v61, 0.0 }
  0x1c   :  { %179 = vst [vmem:[%s460_s6 + $0x60] sm:$0xff] %v163_v63  ;;  %v149_v4 = vadd.f32 %v251_v6, %v129_v0  ;;  %v130_v5 = vadd.f32 %v114_v62, %v78_v3 }
  0x1d   :  { %180 = vst [vmem:[%s460_s6 + $0x68] sm:$0xff] %v164_v1 }
  0x1e   :  { %v165_v7 = vmax.f32 %v149_v4, 0.0  ;;  %v150_v8 = vadd.f32 %v251_v6, %v130_v5 }
  0x20   :  { %181 = vst [vmem:[%s460_s6 + $0x70] sm:$0xff] %v165_v7  ;;  %v166_v2 = vmax.f32 %v150_v8, 0.0 }
  0x22   :  { %182 = vst [vmem:[%s460_s6 + $0x78] sm:$0xff] %v166_v2 }

// kernel: basic_block_forward.6
= control target key start
LH: loop header
LB: loop body
LE: loop exit
PB: predicated region body
PF: predicated region fallthrough
CT: control target
= control target key end

     0   :  { %vm522_vm0 = vcmask 1040384   ;;  %vm524_vm1 = vcmask 1041408   ;;  %vm526_vm2 = vcmask 1042432   ;;  %s1019_s1 = inlined_call_operand.vmem [shape: bf16[128,128], index: 1, kind: input, shape index: {}]   ;;  %s1020_s3 = inlined_call_operand.vmem [shape: bf16[128,128], index: 3, kind: input, shape index: {}]   ;;  %s1021_s0 = inlined_call_operand.vmem [shape: bf16[128,128], index: 0, kind: input, shape index: {}]   ;;  %s1022_s2 = inlined_call_operand.vmem [shape: bf16[128,128], index: 2, kind: input, shape index: {}]   ;;  %s1023_s4 = inlined_call_operand.vmem [shape: f32[128,128], index: 4, kind: output, shape index: {0}]   ;;  %s1024_s5 = inlined_call_operand.vmem [shape: f32[128,128], index: 5, kind: output, shape index: {1}]   ;;  %s1025_s6 = inlined_call_operand.vmem [shape: f32[1,4,128], index: 6, kind: output, shape index: {2}]  }
   0x1   :  { %v684_v0 = vld [vmem:[%s1019_s1 + $0x38] sm:$0xff]  ;;  %v683_v2 = vld [vmem:[%s1019_s1 + $0x30] sm:$0xff]  ;;  %v682_v4 = vld [vmem:[%s1019_s1 + $0x28] sm:$0xff] }
   0x2   :  { %v700_v1 = vld [vmem:[%s1020_s3 + $0x38] sm:$0xff]  ;;  %148 = vmatpush.bf16.msra.mxu0 %v684_v0  ;;  %v699_v3 = vld [vmem:[%s1020_s3 + $0x30] sm:$0xff]  ;;  %701 = vmatpush.bf16.msra.mxu2 %v684_v0  ;;  %v698_v5 = vld [vmem:[%s1020_s3 + $0x28] sm:$0xff] }
   0x3   :  { %325 = vmatpush.bf16.msra.mxu1 %v700_v1  ;;  %709 = vmatpush.bf16.msra.mxu3 %v700_v1  ;;  %v681_v6 = vld [vmem:[%s1019_s1 + $0x20] sm:$0xff]  ;;  %v680_v8 = vld [vmem:[%s1019_s1 + $0x18] sm:$0xff]  ;;  %v679_v10 = vld [vmem:[%s1019_s1 + $0x10] sm:$0xff] }
   0x4   :  { %v697_v7 = vld [vmem:[%s1020_s3 + $0x20] sm:$0xff]  ;;  %v696_v9 = vld [vmem:[%s1020_s3 + $0x18] sm:$0xff]  ;;  %v695_v11 = vld [vmem:[%s1020_s3 + $0x10] sm:$0xff] }
   0x5   :  { %v678_v12 = vld [vmem:[%s1019_s1 + $0x8] sm:$0xff]  ;;  %v677_v14 = vld [vmem:[%s1019_s1] sm:$0xff]  ;;  %v671_v24 = vld [vmem:[%s1021_s0 + $0x10] sm:$0xff] }
   0x6   :  { %149 = vmatpush.bf16.msra.mxu0 %v683_v2  ;;  %702 = vmatpush.bf16.msra.mxu2 %v683_v2  ;;  %v694_v13 = vld [vmem:[%s1020_s3 + $0x8] sm:$0xff]  ;;  %v693_v15 = vld [vmem:[%s1020_s3] sm:$0xff]  ;;  %v687_v25 = vld [vmem:[%s1022_s2 + $0x10] sm:$0xff] }
   0x7   :  { %326 = vmatpush.bf16.msra.mxu1 %v699_v3  ;;  %710 = vmatpush.bf16.msra.mxu3 %v699_v3  ;;  %v669_v16 = vld [vmem:[%s1021_s0] sm:$0xff]  ;;  %v670_v20 = vld [vmem:[%s1021_s0 + $0x8] sm:$0xff]  ;;  %v675_v26 = vld [vmem:[%s1021_s0 + $0x30] sm:$0xff] }
   0x8   :  { %v685_v17 = vld [vmem:[%s1022_s2] sm:$0xff]  ;;  %v686_v21 = vld [vmem:[%s1022_s2 + $0x8] sm:$0xff]  ;;  %v691_v27 = vld [vmem:[%s1022_s2 + $0x30] sm:$0xff] }
   0x9   :  { %v673_v18 = vld [vmem:[%s1021_s0 + $0x20] sm:$0xff]  ;;  %v674_v22 = vld [vmem:[%s1021_s0 + $0x28] sm:$0xff]  ;;  %v672_v28 = vld [vmem:[%s1021_s0 + $0x18] sm:$0xff] }
   0xa   :  { %150 = vmatpush.bf16.msra.mxu0 %v682_v4  ;;  %703 = vmatpush.bf16.msra.mxu2 %v682_v4  ;;  %v689_v19 = vld [vmem:[%s1022_s2 + $0x20] sm:$0xff]  ;;  %v690_v23 = vld [vmem:[%s1022_s2 + $0x28] sm:$0xff]  ;;  %v688_v29 = vld [vmem:[%s1022_s2 + $0x18] sm:$0xff] }
   0xb   :  { %327 = vmatpush.bf16.msra.mxu1 %v698_v5  ;;  %711 = vmatpush.bf16.msra.mxu3 %v698_v5  ;;  %v676_v30 = vld [vmem:[%s1021_s0 + $0x38] sm:$0xff] }
   0xc   :  { %v692_v31 = vld [vmem:[%s1022_s2 + $0x38] sm:$0xff] }
   0xe   :  { %151 = vmatpush.bf16.msra.mxu0 %v681_v6  ;;  %704 = vmatpush.bf16.msra.mxu2 %v681_v6 }
   0xf   :  { %328 = vmatpush.bf16.msra.mxu1 %v697_v7  ;;  %712 = vmatpush.bf16.msra.mxu3 %v697_v7 }
  0x12   :  { %152 = vmatpush.bf16.msra.mxu0 %v680_v8  ;;  %705 = vmatpush.bf16.msra.mxu2 %v680_v8 }
  0x13   :  { %329 = vmatpush.bf16.msra.mxu1 %v696_v9  ;;  %713 = vmatpush.bf16.msra.mxu3 %v696_v9 }
  0x16   :  { %153 = vmatpush.bf16.msra.mxu0 %v679_v10  ;;  %706 = vmatpush.bf16.msra.mxu2 %v679_v10 }
  0x17   :  { %330 = vmatpush.bf16.msra.mxu1 %v695_v11  ;;  %714 = vmatpush.bf16.msra.mxu3 %v695_v11 }
  0x1a   :  { %154 = vmatpush.bf16.msra.mxu0 %v678_v12  ;;  %707 = vmatpush.bf16.msra.mxu2 %v678_v12 }
  0x1b   :  { %331 = vmatpush.bf16.msra.mxu1 %v694_v13  ;;  %715 = vmatpush.bf16.msra.mxu3 %v694_v13 }
  0x1e   :  { %155 = vmatpush.bf16.msra.mxu0 %v677_v14  ;;  %708 = vmatpush.bf16.msra.mxu2 %v677_v14 }
  0x1f   :  { %332 = vmatpush.bf16.msra.mxu1 %v693_v15  ;;  %716 = vmatpush.bf16.msra.mxu3 %v693_v15 }
  0x21   :  { %156 = vmatmul.bf16.vlgmr.msra.gmra.mxu0 %v669_v16  ;;  %176 = vmatmul.bf16.vlgmr.msra.gmra.mxu2 %v673_v18 }
  0x22   :  { %333 = vmatmul.bf16.vlgmr.msra.gmra.mxu1 %v685_v17  ;;  %353 = vmatmul.bf16.vlgmr.msra.gmra.mxu3 %v689_v19 }
  0x31   :  { %161 = vmatmul.bf16.gmra.mxu0 %v670_v20  ;;  %181 = vmatmul.bf16.gmra.mxu2 %v674_v22 }
  0x32   :  { %338 = vmatmul.bf16.gmra.mxu1 %v686_v21  ;;  %358 = vmatmul.bf16.gmra.mxu3 %v690_v23 }
  0x41   :  { %166 = vmatmul.bf16.gmra.mxu0 %v671_v24  ;;  %186 = vmatmul.bf16.gmra.mxu2 %v675_v26 }
  0x42   :  { %343 = vmatmul.bf16.gmra.mxu1 %v687_v25  ;;  %363 = vmatmul.bf16.gmra.mxu3 %v691_v27 }
  0x51   :  { %171 = vmatmul.bf16.gmra.mxu0 %v672_v28  ;;  %191 = vmatmul.bf16.gmra.mxu2 %v676_v30 }
  0x52   :  { %348 = vmatmul.bf16.gmra.mxu1 %v688_v29  ;;  %368 = vmatmul.bf16.gmra.mxu3 %v692_v31 }
  0x9e   :  { %v157_v32 = vpop.f32.mrf.mxu0 }
  0x9f   :  { %v334_v33 = vpop.f32.mrf.mxu1  ;;  %374 = vst [vmem:[%s1023_s4] sm:$0xff] %v157_v32  ;;  %v427_v56 = vmul.f32 %v157_v32, %v157_v32 }
  0xa0   :  { %390 = vst [vmem:[%s1024_s5] sm:$0xff] %v334_v33  ;;  %v485_v57 = vmul.f32 %v334_v33, %v334_v33 }
  0xa4   :  { %v854_v34 = vpop.f32.mrf.mxu2 }
  0xa5   :  { %v856_v35 = vpop.f32.mrf.mxu3  ;;  %382 = vst [vmem:[%s1023_s4 + $0x40] sm:$0xff] %v854_v34 }
  0xa6   :  { %v159_v36 = vpop.f32.mrf.mxu0  ;;  %398 = vst [vmem:[%s1024_s5 + $0x40] sm:$0xff] %v856_v35 }
  0xa7   :  { %v336_v37 = vpop.f32.mrf.mxu1  ;;  %375 = vst [vmem:[%s1023_s4 + $0x8] sm:$0xff] %v159_v36  ;;  %v428_v54 = vmul.f32 %v159_v36, %v159_v36  ;;  %v406_v60 = vadd.f32 %v159_v36, %v157_v32 }
  0xa8   :  { %391 = vst [vmem:[%s1024_s5 + $0x8] sm:$0xff] %v336_v37  ;;  %v486_v55 = vmul.f32 %v336_v37, %v336_v37  ;;  %v464_v61 = vadd.f32 %v336_v37, %v334_v33 }
  0xa9   :  { %v443_v62 = vadd.f32 %v428_v54, %v427_v56 }
  0xaa   :  { %v501_v63 = vadd.f32 %v486_v55, %v485_v57 }
  0xac   :  { %v872_v38 = vpop.f32.mrf.mxu2 }
  0xad   :  { %v874_v39 = vpop.f32.mrf.mxu3  ;;  %383 = vst [vmem:[%s1023_s4 + $0x48] sm:$0xff] %v872_v38  ;;  %v436_v56 = vmul.f32 %v872_v38, %v872_v38 }
  0xae   :  { %v162_v40 = vpop.f32.mrf.mxu0  ;;  %399 = vst [vmem:[%s1024_s5 + $0x48] sm:$0xff] %v874_v39  ;;  %v494_v57 = vmul.f32 %v874_v39, %v874_v39 }
  0xaf   :  { %v339_v41 = vpop.f32.mrf.mxu1  ;;  %376 = vst [vmem:[%s1023_s4 + $0x10] sm:$0xff] %v162_v40  ;;  %v429_v58 = vmul.f32 %v162_v40, %v162_v40  ;;  %v407_v2 = vadd.f32 %v406_v60, %v162_v40 }
  0xb0   :  { %392 = vst [vmem:[%s1024_s5 + $0x10] sm:$0xff] %v339_v41  ;;  %v487_v59 = vmul.f32 %v339_v41, %v339_v41  ;;  %v465_v3 = vadd.f32 %v464_v61, %v339_v41 }
  0xb1   :  { %v444_v6 = vadd.f32 %v443_v62, %v429_v58 }
  0xb2   :  { %v502_v7 = vadd.f32 %v501_v63, %v487_v59 }
  0xb4   :  { %v890_v42 = vpop.f32.mrf.mxu2 }
  0xb5   :  { %v892_v43 = vpop.f32.mrf.mxu3  ;;  %384 = vst [vmem:[%s1023_s4 + $0x50] sm:$0xff] %v890_v42 }
  0xb6   :  { %v164_v44 = vpop.f32.mrf.mxu0  ;;  %400 = vst [vmem:[%s1024_s5 + $0x50] sm:$0xff] %v892_v43  ;;  %v495_v61 = vmul.f32 %v892_v43, %v892_v43 }
  0xb7   :  { %v341_v45 = vpop.f32.mrf.mxu1  ;;  %377 = vst [vmem:[%s1023_s4 + $0x18] sm:$0xff] %v164_v44  ;;  %v430_v0 = vmul.f32 %v164_v44, %v164_v44  ;;  %v408_v12 = vadd.f32 %v407_v2, %v164_v44 }
  0xb8   :  { %393 = vst [vmem:[%s1024_s5 + $0x18] sm:$0xff] %v341_v45  ;;  %v488_v1 = vmul.f32 %v341_v45, %v341_v45  ;;  %v466_v13 = vadd.f32 %v465_v3, %v341_v45 }
  0xb9   :  { %v445_v14 = vadd.f32 %v444_v6, %v430_v0 }
  0xba   :  { %v503_v15 = vadd.f32 %v502_v7, %v488_v1 }
  0xbc   :  { %v908_v46 = vpop.f32.mrf.mxu2 }
  0xbd   :  { %v910_v47 = vpop.f32.mrf.mxu3  ;;  %385 = vst [vmem:[%s1023_s4 + $0x58] sm:$0xff] %v908_v46 }
  0xbe   :  { %v167_v48 = vpop.f32.mrf.mxu0  ;;  %401 = vst [vmem:[%s1024_s5 + $0x58] sm:$0xff] %v910_v47 }
  0xbf   :  { %v344_v49 = vpop.f32.mrf.mxu1  ;;  %378 = vst [vmem:[%s1023_s4 + $0x20] sm:$0xff] %v167_v48  ;;  %v431_v8 = vmul.f32 %v167_v48, %v167_v48  ;;  %v409_v18 = vadd.f32 %v408_v12, %v167_v48  ;;  %v435_v48 = vmul.f32 %v854_v34, %v854_v34 }
  0xc0   :  { %394 = vst [vmem:[%s1024_s5 + $0x20] sm:$0xff] %v344_v49  ;;  %v489_v9 = vmul.f32 %v344_v49, %v344_v49  ;;  %v467_v19 = vadd.f32 %v466_v13, %v344_v49  ;;  %v493_v49 = vmul.f32 %v856_v35, %v856_v35 }
  0xc1   :  { %v446_v20 = vadd.f32 %v445_v14, %v431_v8 }
  0xc2   :  { %v504_v21 = vadd.f32 %v503_v15, %v489_v9 }
  0xc4   :  { %v926_v50 = vpop.f32.mrf.mxu2 }
  0xc5   :  { %v928_v51 = vpop.f32.mrf.mxu3  ;;  %386 = vst [vmem:[%s1023_s4 + $0x60] sm:$0xff] %v926_v50 }
  0xc6   :  { %v169_v52 = vpop.f32.mrf.mxu0  ;;  %402 = vst [vmem:[%s1024_s5 + $0x60] sm:$0xff] %v928_v51  ;;  %v497_v9 = vmul.f32 %v928_v51, %v928_v51 }
  0xc7   :  { %v346_v53 = vpop.f32.mrf.mxu1  ;;  %379 = vst [vmem:[%s1023_s4 + $0x28] sm:$0xff] %v169_v52  ;;  %v432_v16 = vmul.f32 %v169_v52, %v169_v52  ;;  %v410_v24 = vadd.f32 %v409_v18, %v169_v52 }
  0xc8   :  { %395 = vst [vmem:[%s1024_s5 + $0x28] sm:$0xff] %v346_v53  ;;  %v490_v17 = vmul.f32 %v346_v53, %v346_v53  ;;  %v468_v25 = vadd.f32 %v467_v19, %v346_v53 }
  0xc9   :  { %v447_v26 = vadd.f32 %v446_v20, %v432_v16 }
  0xca   :  { %v505_v27 = vadd.f32 %v504_v21, %v490_v17 }
  0xcc   :  { %v944_v4 = vpop.f32.mrf.mxu2 }
  0xcd   :  { %v946_v5 = vpop.f32.mrf.mxu3  ;;  %387 = vst [vmem:[%s1023_s4 + $0x68] sm:$0xff] %v944_v4 }
  0xce   :  { %v172_v10 = vpop.f32.mrf.mxu0  ;;  %403 = vst [vmem:[%s1024_s5 + $0x68] sm:$0xff] %v946_v5 }
  0xcf   :  { %v349_v11 = vpop.f32.mrf.mxu1  ;;  %380 = vst [vmem:[%s1023_s4 + $0x30] sm:$0xff] %v172_v10  ;;  %v433_v22 = vmul.f32 %v172_v10, %v172_v10  ;;  %v411_v28 = vadd.f32 %v410_v24, %v172_v10 }
  0xd0   :  { %396 = vst [vmem:[%s1024_s5 + $0x30] sm:$0xff] %v349_v11  ;;  %v491_v23 = vmul.f32 %v349_v11, %v349_v11  ;;  %v469_v29 = vadd.f32 %v468_v25, %v349_v11 }
  0xd1   :  { %v448_v32 = vadd.f32 %v447_v26, %v433_v22 }
  0xd2   :  { %v506_v33 = vadd.f32 %v505_v27, %v491_v23 }
  0xd4   :  { %v192_v30 = vpop.f32.mrf.mxu2 }
  0xd5   :  { %v369_v31 = vpop.f32.mrf.mxu3  ;;  %388 = vst [vmem:[%s1023_s4 + $0x70] sm:$0xff] %v192_v30  ;;  %v441_v18 = vmul.f32 %v192_v30, %v192_v30 }
  0xd6   :  { %v174_v36 = vpop.f32.mrf.mxu0  ;;  %404 = vst [vmem:[%s1024_s5 + $0x70] sm:$0xff] %v369_v31  ;;  %v499_v19 = vmul.f32 %v369_v31, %v369_v31 }
  0xd7   :  { %v351_v37 = vpop.f32.mrf.mxu1  ;;  %381 = vst [vmem:[%s1023_s4 + $0x38] sm:$0xff] %v174_v36  ;;  %v412_v40 = vadd.f32 %v411_v28, %v174_v36  ;;  %v434_v41 = vmul.f32 %v174_v36, %v174_v36 }
  0xd8   :  { %v470_v44 = vadd.f32 %v469_v29, %v351_v37  ;;  %v492_v45 = vmul.f32 %v351_v37, %v351_v37  ;;  %397 = vst [vmem:[%s1024_s5 + $0x38] sm:$0xff] %v351_v37 }
  0xd9   :  { %v413_v52 = vadd.f32 %v412_v40, %v854_v34  ;;  %v449_v53 = vadd.f32 %v448_v32, %v434_v41 }
  0xda   :  { %v471_v54 = vadd.f32 %v470_v44, %v856_v35  ;;  %v507_v55 = vadd.f32 %v506_v33, %v492_v45  ;;  %v437_v35 = vmul.f32 %v890_v42, %v890_v42 }
  0xdb   :  { %v414_v58 = vadd.f32 %v413_v52, %v872_v38  ;;  %v450_v59 = vadd.f32 %v449_v53, %v435_v48  ;;  %v438_v38 = vmul.f32 %v908_v46, %v908_v46 }
  0xdc   :  { %v472_v60 = vadd.f32 %v471_v54, %v874_v39  ;;  %v508_v34 = vadd.f32 %v507_v55, %v493_v49  ;;  %v194_v2 = vpop.f32.mrf.mxu2  ;;  %v496_v39 = vmul.f32 %v910_v47, %v910_v47 }
  0xdd   :  { %v415_v62 = vadd.f32 %v414_v58, %v890_v42  ;;  %v451_v63 = vadd.f32 %v450_v59, %v436_v56  ;;  %v371_v3 = vpop.f32.mrf.mxu3  ;;  %389 = vst [vmem:[%s1023_s4 + $0x78] sm:$0xff] %v194_v2 }
  0xde   :  { %v473_v0 = vadd.f32 %v472_v60, %v892_v43  ;;  %v509_v1 = vadd.f32 %v508_v34, %v494_v57  ;;  %405 = vst [vmem:[%s1024_s5 + $0x78] sm:$0xff] %v371_v3  ;;  %v439_v43 = vmul.f32 %v926_v50, %v926_v50  ;;  %v500_v23 = vmul.f32 %v371_v3, %v371_v3 }
  0xdf   :  { %v452_v6 = vadd.f32 %v451_v63, %v437_v35  ;;  %v416_v7 = vadd.f32 %v415_v62, %v908_v46  ;;  %v440_v46 = vmul.f32 %v944_v4, %v944_v4 }
  0xe0   :  { %v510_v42 = vadd.f32 %v509_v1, %v495_v61  ;;  %v474_v8 = vadd.f32 %v473_v0, %v910_v47  ;;  %v498_v47 = vmul.f32 %v946_v5, %v946_v5 }
  0xe1   :  { %v417_v10 = vadd.f32 %v416_v7, %v926_v50  ;;  %v453_v11 = vadd.f32 %v452_v6, %v438_v38 }
  0xe2   :  { %v475_v12 = vadd.f32 %v474_v8, %v928_v51  ;;  %v511_v13 = vadd.f32 %v510_v42, %v496_v39  ;;  %v442_v51 = vmul.f32 %v194_v2, %v194_v2 }
  0xe3   :  { %v418_v14 = vadd.f32 %v417_v10, %v944_v4  ;;  %v454_v15 = vadd.f32 %v453_v11, %v439_v43 }
  0xe4   :  { %v476_v16 = vadd.f32 %v475_v12, %v946_v5  ;;  %v512_v17 = vadd.f32 %v511_v13, %v497_v9 }
  0xe5   :  { %v419_v20 = vadd.f32 %v418_v14, %v192_v30  ;;  %v455_v50 = vadd.f32 %v454_v15, %v440_v46 }
  0xe6   :  { %v477_v21 = vadd.f32 %v476_v16, %v369_v31  ;;  %v513_v22 = vadd.f32 %v512_v17, %v498_v47 }
  0xe7   :  { %v456_v24 = vadd.f32 %v455_v50, %v441_v18  ;;  %v420_v26 = vadd.f32 %v419_v20, %v194_v2 }
  0xe8   :  { %v514_v25 = vadd.f32 %v513_v22, %v499_v19  ;;  %v478_v27 = vadd.f32 %v477_v21, %v371_v3 }
  0xe9   :  { %v421_v28 = vrot.slane %v420_v26, 4  ;;  %v457_v29 = vadd.f32 %v456_v24, %v442_v51 }
  0xea   :  { %v479_v32 = vrot.slane %v478_v27, 4  ;;  %v515_v4 = vadd.f32 %v514_v25, %v500_v23 }
  0xeb   :  { %v422_v33 = vadd.f32 %v421_v28, %v420_v26  ;;  %v458_v36 = vrot.slane %v457_v29, 4 }
  0xec   :  { %v480_v5 = vadd.f32 %v479_v32, %v478_v27  ;;  %v516_v37 = vrot.slane %v515_v4, 4 }
  0xed   :  { %v423_v40 = vrot.slane %v422_v33, 2  ;;  %v459_v41 = vadd.f32 %v458_v36, %v457_v29 }
  0xee   :  { %v481_v30 = vrot.slane %v480_v5, 2  ;;  %v517_v44 = vadd.f32 %v516_v37, %v515_v4 }
  0xef   :  { %v424_v31 = vadd.f32 %v423_v40, %v422_v33  ;;  %v460_v45 = vrot.slane %v459_v41, 2 }
  0xf0   :  { %v482_v48 = vadd.f32 %v481_v30, %v480_v5  ;;  %v518_v49 = vrot.slane %v517_v44, 2 }
  0xf1   :  { %v425_v52 = vrot.slane %v424_v31, 1  ;;  %v461_v53 = vadd.f32 %v460_v45, %v459_v41 }
  0xf2   :  { %v519_v54 = vadd.f32 %v518_v49, %v517_v44  ;;  %v483_v55 = vrot.slane %v482_v48, 1 }
  0xf3   :  { %v462_v56 = vrot.slane %v461_v53, 1  ;;  %v426_v58 = vadd.f32 %v425_v52, %v424_v31 }
  0xf4   :  { %v520_v57 = vrot.slane %v519_v54, 1  ;;  %v484_v60 = vadd.f32 %v483_v55, %v482_v48 }
  0xf5   :  { %v463_v59 = vadd.f32 %v462_v56, %v461_v53 }
  0xf6   :  { %v521_v35 = vadd.f32 %v520_v57, %v519_v54 }
  0xf7   :  { %v523_v34 = vsel %vm522_vm0, %v426_v58, %v463_v59 }
  0xf8   :  { %v525_v61 = vsel %vm524_vm1, %v523_v34, %v484_v60 }
  0xf9   :  { %v527_v62 = vsel %vm526_vm2, %v525_v61, %v521_v35 }
  0xfa   :  { %528 = vst [vmem:[%s1025_s6] sm:$0xf] %v527_v62 }

</bundles_post_ra>
